<compile_context>
chip_gen: v6e
topology: v6e:2x2x1
jax: 0.10.0
libtpu: 0.0.40
codegen_flags: <defaults>
</compile_context>

<pallas_src>
import math

import jax
import jax.numpy as jnp
from jax import lax
from jax.experimental import pallas as pl
from jax.experimental.pallas import tpu as pltpu

LN_EPS = 1e-5  # nn.LayerNorm default


# ---------------------------------------------------------------------------
# helpers
# ---------------------------------------------------------------------------
def _vmem_limit_bytes():
    """Generation-aware VMEM limit: ~56 MiB on v7x, ~112 MiB on v5e/v6e."""
    try:
        cap = int(pltpu.get_tpu_info().vmem_capacity_bytes)
    except Exception:
        cap = 64 << 20  # conservative (v7x-sized) fallback
    return max(32 << 20, min(cap - (8 << 20), 112 << 20))


def _bspec(shape, index_map, single_buffer):
    """BlockSpec; constant-index blocks get a single resident buffer."""
    if single_buffer:
        return pl.BlockSpec(shape, index_map, pipeline_mode=pl.Buffered(1))
    return pl.BlockSpec(shape, index_map)


def _pick_row_tile(n_rows, lane_w, inner_w, vmem_limit, target_bytes=2 << 20):
    """Adaptive row tile: ~2 MiB f32 activation blocks, VMEM-capped, >=2 steps."""
    if n_rows < 8:
        return n_rows                                    # block == full row extent
    t = target_bytes // (lane_w * 4)                     # ~2 MiB f32 x/out block
    t = min(t, (vmem_limit // 4) // (inner_w * 4))       # cap f32 hidden intermediate
    t = max(8, (t // 8) * 8)
    if t >= 256:
        t = (t // 256) * 256                             # MXU-friendly at scale
    # at least 2 row steps when rows allow, so "parallel" can shard across v7x's 2 TCs
    half = max(8, pl.cdiv(pl.cdiv(n_rows, 2), 8) * 8)
    return int(min(t, half))


def _pick_hidden_block(d_model, hidden, w_bytes, vmem_limit):
    """Split the hidden axis when resident weights would crowd VMEM (v7x: 64 MiB/TC)."""
    budget = max(vmem_limit // 3, 8 << 20)
    if 2 * d_model * hidden * w_bytes <= budget or hidden % 128 != 0:
        return hidden                                    # fully resident weights
    # streamed w1/w2 blocks are double-buffered: 2 * 2 * d_model * blk * w_bytes
    max_blk = max(128, budget // (4 * d_model * w_bytes))
    for unit in (256, 128):                              # 256: v6e/v7x MXU; 128: v5e
        blk = (max_blk // unit) * unit
        while blk >= unit:
            if hidden % blk == 0:
                return blk
            blk -= unit
    return hidden


# ---------------------------------------------------------------------------
# kernels
# ---------------------------------------------------------------------------
def _ffn_kernel_packed(x_ref, prm_ref, b1_ref, avg_ref, w1_ref, w2_ref, o_ref):
    """Lane-packed path (pack logical rows per 128-lane vreg row).

    LayerNorm is a segmented reduction over d_model-lane groups, implemented as
    a tiny block-averaging f32 matmul so everything stays 128-lane dense; the
    two GEMMs use block-diagonal packed weights.
    """
    x = x_ref[...].astype(jnp.float32)
    avg = avg_ref[...]
    prm = prm_ref[...].astype(jnp.float32)   # rows: gamma, beta, b2 (lane-tiled)

    mean = jnp.dot(x, avg, preferred_element_type=jnp.float32,
                   precision=lax.Precision.HIGHEST)
    xc = x - mean
    var = jnp.dot(xc * xc, avg, preferred_element_type=jnp.float32,
                  precision=lax.Precision.HIGHEST)
    xn = xc * lax.rsqrt(var + LN_EPS) * prm[0:1] + prm[1:2]

    h = jnp.dot(xn.astype(w1_ref.dtype), w1_ref[...],
                preferred_element_type=jnp.float32)
    h = jnp.maximum(h + b1_ref[...].astype(jnp.float32), 0.0)
    # TODO(synk): dropout is eval-mode identity; training-mode dropout would
    # mask `h` here via pltpu.prng_seed + pltpu.stateful_bernoulli.
    y = jnp.dot(h.astype(w2_ref.dtype), w2_ref[...],
                preferred_element_type=jnp.float32)
    o_ref[...] = (y + prm[2:3]).astype(o_ref.dtype)


def _ffn_kernel_general(x_ref, prm_ref, b1_ref, w1_ref, w2_ref, o_ref,
                        xn_ref, acc_ref):
    """General path: grid = (row blocks [parallel], hidden blocks [arbitrary]).

    LayerNorm runs once per row block (j == 0) into a bf16 scratch; partial
    GEMM results accumulate in f32 scratch; output written at the last j.
    """
    j = pl.program_id(1)
    nj = pl.num_programs(1)
    prm = prm_ref[...].astype(jnp.float32)   # rows: gamma, beta, b2

    @pl.when(j == 0)
    def _():
        x = x_ref[...].astype(jnp.float32)
        mean = jnp.mean(x, axis=-1, keepdims=True)
        xc = x - mean
        var = jnp.mean(xc * xc, axis=-1, keepdims=True)
        xn = xc * lax.rsqrt(var + LN_EPS) * prm[0:1] + prm[1:2]
        xn_ref[...] = xn.astype(xn_ref.dtype)
        acc_ref[...] = jnp.zeros_like(acc_ref)

    h = jnp.dot(xn_ref[...], w1_ref[...], preferred_element_type=jnp.float32)
    h = jnp.maximum(h + b1_ref[...].astype(jnp.float32), 0.0)
    # TODO(synk): dropout is eval-mode identity here as well.
    acc_ref[...] += jnp.dot(h.astype(w2_ref.dtype), w2_ref[...],
                            preferred_element_type=jnp.float32)

    @pl.when(j == nj - 1)
    def _():
        o_ref[...] = (acc_ref[...] + prm[2:3]).astype(o_ref.dtype)


# ---------------------------------------------------------------------------
# wrapper
# ---------------------------------------------------------------------------
def feed_forward_layer(src, gamma, beta, w1, b1, w2, b2, *,
                       matmul_dtype=jnp.bfloat16, hidden_block=None):
    """Fused FeedForwardLayer forward.

    src: (B, L, d_model).  w1: (d_model, hidden) and w2: (hidden, d_model) are
    the transposes of the nn.Linear weight storage.  Dropout = eval identity.
    """
    B, L, d_model = src.shape
    hidden = w1.shape[1]
    n_rows = B * L
    out_dtype = src.dtype
    vmem_limit = _vmem_limit_bytes()
    w_bytes = jnp.dtype(matmul_dtype).itemsize

    # ---- lane-dense packed path for small feature dims (e.g. d_model=32) ----
    pack = 1
    if d_model < 128 and 128 % d_model == 0:
        pack = math.gcd(128 // d_model, n_rows)   # gcd => never pad/copy src

    if pack > 1:
        lane_w = pack * d_model
        ph = pack * hidden
        rows_p = n_rows // pack
        tile = _pick_row_tile(rows_p, lane_w, ph, vmem_limit)
        grid = (pl.cdiv(rows_p, tile),)

        x2d = src.reshape(rows_p, lane_w)          # free: row-major bytes identical
        prm = jnp.stack([jnp.tile(gamma.astype(jnp.float32), pack),
                         jnp.tile(beta.astype(jnp.float32), pack),
                         jnp.tile(b2.astype(jnp.float32), pack)])
        b1p = jnp.tile(b1.astype(jnp.float32), pack).reshape(1, ph)
        eye = jnp.eye(pack, dtype=jnp.float32)
        avg = jnp.kron(eye, jnp.full((d_model, d_model), 1.0 / d_model, jnp.float32))
        w1p = jnp.kron(eye, w1.astype(jnp.float32)).astype(matmul_dtype)
        w2p = jnp.kron(eye, w2.astype(jnp.float32)).astype(matmul_dtype)

        def run(single_buffer):
            in_specs = [
                pl.BlockSpec((tile, lane_w), lambda i: (i, 0)),
                _bspec((3, lane_w), lambda i: (0, 0), single_buffer),
                _bspec((1, ph), lambda i: (0, 0), single_buffer),
                _bspec((lane_w, lane_w), lambda i: (0, 0), single_buffer),
                _bspec((lane_w, ph), lambda i: (0, 0), single_buffer),
                _bspec((ph, lane_w), lambda i: (0, 0), single_buffer),
            ]
            return pl.pallas_call(
                _ffn_kernel_packed,
                out_shape=jax.ShapeDtypeStruct((rows_p, lane_w), out_dtype),
                grid_spec=pltpu.PrefetchScalarGridSpec(
                    num_scalar_prefetch=0, grid=grid,
                    in_specs=in_specs,
                    out_specs=pl.BlockSpec((tile, lane_w), lambda i: (i, 0))),
                compiler_params=pltpu.CompilerParams(
                    dimension_semantics=("parallel",),
                    vmem_limit_bytes=vmem_limit),
            )(x2d, prm, b1p, avg, w1p, w2p)

        try:
            out = run(True)
        except Exception:          # installed jax may reject Buffered(1)
            out = run(False)
        return out.reshape(B, L, d_model)

    # ---- general path (d_model >= 128 / not lane-packable), hidden-axis split ----
    if hidden_block is None:
        h_blk = _pick_hidden_block(d_model, hidden, w_bytes, vmem_limit)
    else:
        assert hidden % hidden_block == 0 and (
            hidden_block % 128 == 0 or hidden_block == hidden)
        h_blk = hidden_block
    n_h = hidden // h_blk
    tile = _pick_row_tile(n_rows, d_model, h_blk, vmem_limit)
    grid = (pl.cdiv(n_rows, tile), n_h)

    x2d = src.reshape(n_rows, d_model)
    prm = jnp.stack([gamma.astype(jnp.float32),
                     beta.astype(jnp.float32),
                     b2.astype(jnp.float32)])
    b1r = b1.astype(jnp.float32).reshape(1, hidden)
    w1c = w1.astype(matmul_dtype)
    w2c = w2.astype(matmul_dtype)

    def run(single_buffer):
        sb_w = single_buffer and n_h == 1   # weights constant-index only if unsplit
        in_specs = [
            pl.BlockSpec((tile, d_model), lambda i, j: (i, 0)),
            _bspec((3, d_model), lambda i, j: (0, 0), single_buffer),
            _bspec((1, h_blk), lambda i, j: (0, j), sb_w),
            _bspec((d_model, h_blk), lambda i, j: (0, j), sb_w),
            _bspec((h_blk, d_model), lambda i, j: (j, 0), sb_w),
        ]
        return pl.pallas_call(
            _ffn_kernel_general,
            out_shape=jax.ShapeDtypeStruct((n_rows, d_model), out_dtype),
            grid_spec=pltpu.PrefetchScalarGridSpec(
                num_scalar_prefetch=0, grid=grid,
                in_specs=in_specs,
                out_specs=pl.BlockSpec((tile, d_model), lambda i, j: (i, 0)),
                scratch_shapes=[pltpu.VMEM((tile, d_model), matmul_dtype),
                                pltpu.VMEM((tile, d_model), jnp.float32)]),
            compiler_params=pltpu.CompilerParams(
                dimension_semantics=("parallel", "arbitrary"),
                vmem_limit_bytes=vmem_limit),
        )(x2d, prm, b1r, w1c, w2c)

    try:
        out = run(True)
    except Exception:
        out = run(False)
    return out.reshape(B, L, d_model)


# ---------------------------------------------------------------------------
# reference + self-test
# ---------------------------------------------------------------------------
def reference_ffn(src, gamma, beta, w1, b1, w2, b2, matmul_dtype=jnp.bfloat16):
    """Pure-JAX reference mirroring the kernel's bf16-matmul / f32-accumulate numerics."""
    x = src.astype(jnp.float32)
    mean = jnp.mean(x, axis=-1, keepdims=True)
    var = jnp.mean((x - mean) ** 2, axis=-1, keepdims=True)
    xn = (x - mean) * lax.rsqrt(var + LN_EPS) * gamma.astype(jnp.float32) \
        + beta.astype(jnp.float32)
    h = jnp.dot(xn.astype(matmul_dtype), w1.astype(matmul_dtype),
                preferred_element_type=jnp.float32) + b1.astype(jnp.float32)
    h = jnp.maximum(h, 0.0)
    y = jnp.dot(h.astype(matmul_dtype), w2.astype(matmul_dtype),
                preferred_element_type=jnp.float32) + b2.astype(jnp.float32)
    return y.astype(src.dtype)


if __name__ == "__main__":
    key = jax.random.PRNGKey(0)
    keys = jax.random.split(key, 6)

    def make_params(k, d_model, r_ff):
        hidden = d_model * r_ff
        k1, k2, k3, k4, k5, k6 = jax.random.split(k, 6)
        gamma = 1.0 + 0.1 * jax.random.normal(k1, (d_model,), jnp.float32)
        beta = 0.1 * jax.random.normal(k2, (d_model,), jnp.float32)
        # PyTorch stores linear1.weight as (hidden, d_model); math layout = transpose.
        w1 = (jax.random.normal(k3, (hidden, d_model), jnp.float32)
              * (2.0 / d_model) ** 0.5).T          # kaiming_normal_(relu)
        # The module zero-inits linear1.bias / linear2.*; nonzero values here so the
        # bias adds and the second GEMM are actually exercised/validated.
        b1 = 0.05 * jax.random.normal(k4, (hidden,), jnp.float32)
        w2 = 0.05 * jax.random.normal(k5, (hidden, d_model), jnp.float32)
        b2 = 0.1 * jax.random.normal(k6, (d_model,), jnp.float32)
        return gamma, beta, w1, b1, w2, b2

    def check(out, ref):
        assert out.shape == ref.shape and out.dtype == ref.dtype
        err = float(jnp.max(jnp.abs(out - ref)))
        assert jnp.allclose(out, ref, atol=5e-3, rtol=5e-3), err

    # Case 1: module-spec config (d_model=32, r_ff=4), tiny shape -> lane-packed path.
    p32 = make_params(keys[0], 32, 4)
    src1 = jax.random.normal(keys[1], (2, 8, 32), jnp.float32)
    out1 = jax.block_until_ready(feed_forward_layer(src1, *p32))
    check(out1, reference_ffn(src1, *p32))

    # Case 2: row count not a multiple of the row tile -> partial final block and a
    # multi-step "parallel" row grid, still lane-packed, no padding copies.
    src2 = jax.random.normal(keys[2], (4, 100, 32), jnp.float32)
    out2 = jax.block_until_ready(feed_forward_layer(src2, *p32))
    check(out2, reference_ffn(src2, *p32))

    # Case 3: wide-feature path with a forced hidden-axis split (the large-FFN /
    # v7x configuration): 2-D grid, f32 accumulator scratch, streamed w1/w2 blocks.
    p256 = make_params(keys[3], 256, 4)
    src3 = jax.random.normal(keys[4], (3, 17, 256), jnp.float32)
    out3 = jax.block_until_ready(feed_forward_layer(src3, *p256, hidden_block=256))
    check(out3, reference_ffn(src3, *p256))

    print("KERNEL_OK")
</pallas_src>

<mosaic_0001>
module attributes {stable_mosaic.version = 11 : i64} {
  func.func @_ffn_kernel_packed(%arg0: i32, %arg1: memref<4x128xf32, #tpu.memory_space<vmem>>, %arg2: memref<3x128xf32, #tpu.memory_space<vmem>>, %arg3: memref<1x512xf32, #tpu.memory_space<vmem>>, %arg4: memref<128x128xf32, #tpu.memory_space<vmem>>, %arg5: memref<128x512xbf16, #tpu.memory_space<vmem>>, %arg6: memref<512x128xbf16, #tpu.memory_space<vmem>>, %arg7: memref<4x128xf32, #tpu.memory_space<vmem>>) attributes {dimension_semantics = [#tpu.dimension_semantics<parallel>], iteration_bounds = array<i64: 1>, scalar_prefetch = 0 : i64, scratch_operands = 0 : i64, tpu.core_type = #tpu.core_type<tc>, window_params = [{transform_indices = @transform_0, window_bounds = array<i64: 4, 128>}, {pipeline_mode = #tpu.pipeline_mode<synchronous>, transform_indices = @transform_1, window_bounds = array<i64: 3, 128>}, {pipeline_mode = #tpu.pipeline_mode<synchronous>, transform_indices = @transform_2, window_bounds = array<i64: 1, 512>}, {pipeline_mode = #tpu.pipeline_mode<synchronous>, transform_indices = @transform_3, window_bounds = array<i64: 128, 128>}, {pipeline_mode = #tpu.pipeline_mode<synchronous>, transform_indices = @transform_4, window_bounds = array<i64: 128, 512>}, {pipeline_mode = #tpu.pipeline_mode<synchronous>, transform_indices = @transform_5, window_bounds = array<i64: 512, 128>}, {transform_indices = @transform_6, window_bounds = array<i64: 4, 128>}]} {
    %c0 = arith.constant 0 : index
    %c0_0 = arith.constant 0 : index
    %0 = vector.load %arg1[%c0, %c0_0] : memref<4x128xf32, #tpu.memory_space<vmem>>, vector<4x128xf32>
    %c0_1 = arith.constant 0 : index
    %c0_2 = arith.constant 0 : index
    %1 = vector.load %arg4[%c0_1, %c0_2] : memref<128x128xf32, #tpu.memory_space<vmem>>, vector<128x128xf32>
    %c0_3 = arith.constant 0 : index
    %c0_4 = arith.constant 0 : index
    %2 = vector.load %arg2[%c0_3, %c0_4] : memref<3x128xf32, #tpu.memory_space<vmem>>, vector<3x128xf32>
    %cst = arith.constant dense<0.000000e+00> : vector<4x128xf32>
    %3 = tpu.matmul %0, %1, %cst {dimension_numbers = #tpu.dot_dimension_numbers<[1], [0], [0], [1], [0, 0, 1, 1], [], []>, precision = #tpu.contract_precision<fp32>} : vector<4x128xf32>, vector<128x128xf32>, vector<4x128xf32> -> vector<4x128xf32>
    %4 = arith.subf %0, %3 : vector<4x128xf32>
    %5 = arith.mulf %4, %4 : vector<4x128xf32>
    %cst_5 = arith.constant dense<0.000000e+00> : vector<4x128xf32>
    %6 = tpu.matmul %5, %1, %cst_5 {dimension_numbers = #tpu.dot_dimension_numbers<[1], [0], [0], [1], [0, 0, 1, 1], [], []>, precision = #tpu.contract_precision<fp32>} : vector<4x128xf32>, vector<128x128xf32>, vector<4x128xf32> -> vector<4x128xf32>
    %cst_6 = arith.constant 9.99999974E-6 : f32
    %7 = vector.broadcast %cst_6 : f32 to vector<4x128xf32>
    %8 = arith.addf %6, %7 : vector<4x128xf32>
    %9 = math.rsqrt %8 : vector<4x128xf32>
    %10 = arith.mulf %4, %9 : vector<4x128xf32>
    %11 = vector.extract_strided_slice %2 {offsets = [0, 0], sizes = [1, 128], strides = [1, 1]} : vector<3x128xf32> to vector<1x128xf32>
    %12 = vector.broadcast %11 : vector<1x128xf32> to vector<4x128xf32>
    %13 = arith.mulf %10, %12 : vector<4x128xf32>
    %14 = vector.extract_strided_slice %2 {offsets = [1, 0], sizes = [1, 128], strides = [1, 1]} : vector<3x128xf32> to vector<1x128xf32>
    %15 = vector.broadcast %14 : vector<1x128xf32> to vector<4x128xf32>
    %16 = arith.addf %13, %15 : vector<4x128xf32>
    %17 = arith.truncf %16 : vector<4x128xf32> to vector<4x128xbf16>
    %c0_7 = arith.constant 0 : index
    %c0_8 = arith.constant 0 : index
    %18 = vector.load %arg5[%c0_7, %c0_8] : memref<128x512xbf16, #tpu.memory_space<vmem>>, vector<128x512xbf16>
    %cst_9 = arith.constant dense<0.000000e+00> : vector<4x512xf32>
    %19 = tpu.matmul %17, %18, %cst_9 {dimension_numbers = #tpu.dot_dimension_numbers<[1], [0], [0], [1], [0, 0, 1, 1], [], []>} : vector<4x128xbf16>, vector<128x512xbf16>, vector<4x512xf32> -> vector<4x512xf32>
    %c0_10 = arith.constant 0 : index
    %c0_11 = arith.constant 0 : index
    %20 = vector.load %arg3[%c0_10, %c0_11] : memref<1x512xf32, #tpu.memory_space<vmem>>, vector<1x512xf32>
    %21 = vector.broadcast %20 : vector<1x512xf32> to vector<4x512xf32>
    %22 = arith.addf %19, %21 : vector<4x512xf32>
    %cst_12 = arith.constant 0.000000e+00 : f32
    %23 = vector.broadcast %cst_12 : f32 to vector<4x512xf32>
    %24 = arith.maximumf %22, %23 : vector<4x512xf32>
    %25 = arith.truncf %24 : vector<4x512xf32> to vector<4x512xbf16>
    %c0_13 = arith.constant 0 : index
    %c0_14 = arith.constant 0 : index
    %26 = vector.load %arg6[%c0_13, %c0_14] : memref<512x128xbf16, #tpu.memory_space<vmem>>, vector<512x128xbf16>
    %cst_15 = arith.constant dense<0.000000e+00> : vector<4x128xf32>
    %27 = tpu.matmul %25, %26, %cst_15 {dimension_numbers = #tpu.dot_dimension_numbers<[1], [0], [0], [1], [0, 0, 1, 1], [], []>} : vector<4x512xbf16>, vector<512x128xbf16>, vector<4x128xf32> -> vector<4x128xf32>
    %28 = vector.extract_strided_slice %2 {offsets = [2, 0], sizes = [1, 128], strides = [1, 1]} : vector<3x128xf32> to vector<1x128xf32>
    %29 = vector.broadcast %28 : vector<1x128xf32> to vector<4x128xf32>
    %30 = arith.addf %27, %29 : vector<4x128xf32>
    %c0_16 = arith.constant 0 : index
    %c0_17 = arith.constant 0 : index
    %31 = vector.load %arg7[%c0_16, %c0_17] : memref<4x128xf32, #tpu.memory_space<vmem>>, vector<4x128xf32>
    tpu.vector_store %arg7[%c0_16, %c0_17], %30 {strides = array<i32>} : memref<4x128xf32, #tpu.memory_space<vmem>>, vector<4x128xf32>,
    return
  }
  func.func @transform_0(%arg0: i32) -> (i32, i32) {
    %c0_i32 = arith.constant 0 : i32
    %c0_i32_0 = arith.constant 0 : i32
    return %arg0, %c0_i32 : i32, i32
  }
  func.func @transform_1(%arg0: i32) -> (i32, i32) {
    %c0_i32 = arith.constant 0 : i32
    %c0_i32_0 = arith.constant 0 : i32
    %c0_i32_1 = arith.constant 0 : i32
    return %c0_i32, %c0_i32_0 : i32, i32
  }
  func.func @transform_2(%arg0: i32) -> (i32, i32) {
    %c0_i32 = arith.constant 0 : i32
    %c0_i32_0 = arith.constant 0 : i32
    %c0_i32_1 = arith.constant 0 : i32
    return %c0_i32, %c0_i32_0 : i32, i32
  }
  func.func @transform_3(%arg0: i32) -> (i32, i32) {
    %c0_i32 = arith.constant 0 : i32
    %c0_i32_0 = arith.constant 0 : i32
    %c0_i32_1 = arith.constant 0 : i32
    return %c0_i32, %c0_i32_0 : i32, i32
  }
  func.func @transform_4(%arg0: i32) -> (i32, i32) {
    %c0_i32 = arith.constant 0 : i32
    %c0_i32_0 = arith.constant 0 : i32
    %c0_i32_1 = arith.constant 0 : i32
    return %c0_i32, %c0_i32_0 : i32, i32
  }
  func.func @transform_5(%arg0: i32) -> (i32, i32) {
    %c0_i32 = arith.constant 0 : i32
    %c0_i32_0 = arith.constant 0 : i32
    %c0_i32_1 = arith.constant 0 : i32
    return %c0_i32, %c0_i32_0 : i32, i32
  }
  func.func @transform_6(%arg0: i32) -> (i32, i32) {
    %c0_i32 = arith.constant 0 : i32
    %c0_i32_0 = arith.constant 0 : i32
    return %arg0, %c0_i32 : i32, i32
  }
}

module attributes {stable_mosaic.version = 11 : i64} {
  func.func @_ffn_kernel_packed(%arg0: i32, %arg1: memref<4x128xf32, #tpu.memory_space<vmem>>, %arg2: memref<3x128xf32, #tpu.memory_space<vmem>>, %arg3: memref<1x512xf32, #tpu.memory_space<vmem>>, %arg4: memref<128x128xf32, #tpu.memory_space<vmem>>, %arg5: memref<128x512xbf16, #tpu.memory_space<vmem>>, %arg6: memref<512x128xbf16, #tpu.memory_space<vmem>>, %arg7: memref<4x128xf32, #tpu.memory_space<vmem>>) attributes {dimension_semantics = [#tpu.dimension_semantics<parallel>], iteration_bounds = array<i64: 1>, scalar_prefetch = 0 : i64, scratch_operands = 0 : i64, tpu.core_type = #tpu.core_type<tc>, window_params = [{transform_indices = @transform_0, window_bounds = array<i64: 4, 128>}, {pipeline_mode = #tpu.pipeline_mode<synchronous>, transform_indices = @transform_1, window_bounds = array<i64: 3, 128>}, {pipeline_mode = #tpu.pipeline_mode<synchronous>, transform_indices = @transform_2, window_bounds = array<i64: 1, 512>}, {pipeline_mode = #tpu.pipeline_mode<synchronous>, transform_indices = @transform_3, window_bounds = array<i64: 128, 128>}, {pipeline_mode = #tpu.pipeline_mode<synchronous>, transform_indices = @transform_4, window_bounds = array<i64: 128, 512>}, {pipeline_mode = #tpu.pipeline_mode<synchronous>, transform_indices = @transform_5, window_bounds = array<i64: 512, 128>}, {transform_indices = @transform_6, window_bounds = array<i64: 4, 128>}]} {
    %c0 = arith.constant 0 : index
    %c0_0 = arith.constant 0 : index
    %0 = vector.load %arg1[%c0, %c0_0] : memref<4x128xf32, #tpu.memory_space<vmem>>, vector<4x128xf32>
    %c0_1 = arith.constant 0 : index
    %c0_2 = arith.constant 0 : index
    %1 = vector.load %arg4[%c0_1, %c0_2] : memref<128x128xf32, #tpu.memory_space<vmem>>, vector<128x128xf32>
    %c0_3 = arith.constant 0 : index
    %c0_4 = arith.constant 0 : index
    %2 = vector.load %arg2[%c0_3, %c0_4] : memref<3x128xf32, #tpu.memory_space<vmem>>, vector<3x128xf32>
    %cst = arith.constant dense<0.000000e+00> : vector<4x128xf32>
    %3 = tpu.matmul %0, %1, %cst {dimension_numbers = #tpu.dot_dimension_numbers<[1], [0], [0], [1], [0, 0, 1, 1], [], []>, precision = #tpu.contract_precision<fp32>} : vector<4x128xf32>, vector<128x128xf32>, vector<4x128xf32> -> vector<4x128xf32>
    %4 = arith.subf %0, %3 : vector<4x128xf32>
    %5 = arith.mulf %4, %4 : vector<4x128xf32>
    %cst_5 = arith.constant dense<0.000000e+00> : vector<4x128xf32>
    %6 = tpu.matmul %5, %1, %cst_5 {dimension_numbers = #tpu.dot_dimension_numbers<[1], [0], [0], [1], [0, 0, 1, 1], [], []>, precision = #tpu.contract_precision<fp32>} : vector<4x128xf32>, vector<128x128xf32>, vector<4x128xf32> -> vector<4x128xf32>
    %cst_6 = arith.constant 9.99999974E-6 : f32
    %7 = vector.broadcast %cst_6 : f32 to vector<4x128xf32>
    %8 = arith.addf %6, %7 : vector<4x128xf32>
    %9 = math.rsqrt %8 : vector<4x128xf32>
    %10 = arith.mulf %4, %9 : vector<4x128xf32>
    %11 = vector.extract_strided_slice %2 {offsets = [0, 0], sizes = [1, 128], strides = [1, 1]} : vector<3x128xf32> to vector<1x128xf32>
    %12 = vector.broadcast %11 : vector<1x128xf32> to vector<4x128xf32>
    %13 = arith.mulf %10, %12 : vector<4x128xf32>
    %14 = vector.extract_strided_slice %2 {offsets = [1, 0], sizes = [1, 128], strides = [1, 1]} : vector<3x128xf32> to vector<1x128xf32>
    %15 = vector.broadcast %14 : vector<1x128xf32> to vector<4x128xf32>
    %16 = arith.addf %13, %15 : vector<4x128xf32>
    %17 = arith.truncf %16 : vector<4x128xf32> to vector<4x128xbf16>
    %c0_7 = arith.constant 0 : index
    %c0_8 = arith.constant 0 : index
    %18 = vector.load %arg5[%c0_7, %c0_8] : memref<128x512xbf16, #tpu.memory_space<vmem>>, vector<128x512xbf16>
    %cst_9 = arith.constant dense<0.000000e+00> : vector<4x512xf32>
    %19 = tpu.matmul %17, %18, %cst_9 {dimension_numbers = #tpu.dot_dimension_numbers<[1], [0], [0], [1], [0, 0, 1, 1], [], []>} : vector<4x128xbf16>, vector<128x512xbf16>, vector<4x512xf32> -> vector<4x512xf32>
    %c0_10 = arith.constant 0 : index
    %c0_11 = arith.constant 0 : index
    %20 = vector.load %arg3[%c0_10, %c0_11] : memref<1x512xf32, #tpu.memory_space<vmem>>, vector<1x512xf32>
    %21 = vector.broadcast %20 : vector<1x512xf32> to vector<4x512xf32>
    %22 = arith.addf %19, %21 : vector<4x512xf32>
    %cst_12 = arith.constant 0.000000e+00 : f32
    %23 = vector.broadcast %cst_12 : f32 to vector<4x512xf32>
    %24 = arith.maximumf %22, %23 : vector<4x512xf32>
    %25 = arith.truncf %24 : vector<4x512xf32> to vector<4x512xbf16>
    %c0_13 = arith.constant 0 : index
    %c0_14 = arith.constant 0 : index
    %26 = vector.load %arg6[%c0_13, %c0_14] : memref<512x128xbf16, #tpu.memory_space<vmem>>, vector<512x128xbf16>
    %cst_15 = arith.constant dense<0.000000e+00> : vector<4x128xf32>
    %27 = tpu.matmul %25, %26, %cst_15 {dimension_numbers = #tpu.dot_dimension_numbers<[1], [0], [0], [1], [0, 0, 1, 1], [], []>} : vector<4x512xbf16>, vector<512x128xbf16>, vector<4x128xf32> -> vector<4x128xf32>
    %28 = vector.extract_strided_slice %2 {offsets = [2, 0], sizes = [1, 128], strides = [1, 1]} : vector<3x128xf32> to vector<1x128xf32>
    %29 = vector.broadcast %28 : vector<1x128xf32> to vector<4x128xf32>
    %30 = arith.addf %27, %29 : vector<4x128xf32>
    %c0_16 = arith.constant 0 : index
    %c0_17 = arith.constant 0 : index
    %31 = vector.load %arg7[%c0_16, %c0_17] : memref<4x128xf32, #tpu.memory_space<vmem>>, vector<4x128xf32>
    tpu.vector_store %arg7[%c0_16, %c0_17], %30 {strides = array<i32>} : memref<4x128xf32, #tpu.memory_space<vmem>>, vector<4x128xf32>,
    return
  }
  func.func @transform_0(%arg0: i32) -> (i32, i32) {
    %c0_i32 = arith.constant 0 : i32
    %c0_i32_0 = arith.constant 0 : i32
    return %arg0, %c0_i32 : i32, i32
  }
  func.func @transform_1(%arg0: i32) -> (i32, i32) {
    %c0_i32 = arith.constant 0 : i32
    %c0_i32_0 = arith.constant 0 : i32
    %c0_i32_1 = arith.constant 0 : i32
    return %c0_i32, %c0_i32_0 : i32, i32
  }
  func.func @transform_2(%arg0: i32) -> (i32, i32) {
    %c0_i32 = arith.constant 0 : i32
    %c0_i32_0 = arith.constant 0 : i32
    %c0_i32_1 = arith.constant 0 : i32
    return %c0_i32, %c0_i32_0 : i32, i32
  }
  func.func @transform_3(%arg0: i32) -> (i32, i32) {
    %c0_i32 = arith.constant 0 : i32
    %c0_i32_0 = arith.constant 0 : i32
    %c0_i32_1 = arith.constant 0 : i32
    return %c0_i32, %c0_i32_0 : i32, i32
  }
  func.func @transform_4(%arg0: i32) -> (i32, i32) {
    %c0_i32 = arith.constant 0 : i32
    %c0_i32_0 = arith.constant 0 : i32
    %c0_i32_1 = arith.constant 0 : i32
    return %c0_i32, %c0_i32_0 : i32, i32
  }
  func.func @transform_5(%arg0: i32) -> (i32, i32) {
    %c0_i32 = arith.constant 0 : i32
    %c0_i32_0 = arith.constant 0 : i32
    %c0_i32_1 = arith.constant 0 : i32
    return %c0_i32, %c0_i32_0 : i32, i32
  }
  func.func @transform_6(%arg0: i32) -> (i32, i32) {
    %c0_i32 = arith.constant 0 : i32
    %c0_i32_0 = arith.constant 0 : i32
    return %arg0, %c0_i32 : i32, i32
  }
}

</mosaic_0001>

<bundles_post_ra>
// kernel: tpu_custom_call.1
= control target key start
LH: loop header
LB: loop body
LE: loop exit
PB: predicated region body
PF: predicated region fallthrough
CT: control target
= control target key end

     0   :  { %11 = vsyncpa [#allocation3], 0  ;;  %s3786_s0 = inlined_call_operand.hbm [shape: f32[4,128], index: 0, kind: input, shape index: {}]   ;;  %s3787_s1 = inlined_call_operand.hbm [shape: f32[3,128], index: 1, kind: input, shape index: {}]   ;;  %s3788_s2 = inlined_call_operand.hbm [shape: f32[1,512], index: 2, kind: input, shape index: {}]   ;;  %s3789_s3 = inlined_call_operand.hbm [shape: f32[128,128], index: 3, kind: input, shape index: {}]   ;;  %s3790_s4 = inlined_call_operand.hbm [shape: bf16[128,512], index: 4, kind: input, shape index: {}]   ;;  %s3791_s5 = inlined_call_operand.hbm [shape: bf16[512,128], index: 5, kind: input, shape index: {}]   ;;  %s3792_s6 = inlined_call_operand.hbm [shape: f32[4,128], index: 6, kind: output, shape index: {}]  }
   0x1   :  { %12 = vsyncpa [#allocation6], 0 }
   0x2   :  { %13 = vsyncpa [#allocation9], 0 }
   0x3   :  { %14 = vsyncpa [#allocation12], 0 }
   0x4   :  { %15 = vsyncpa [#allocation4], 0  ;;  %s3059_s21 = smov [#allocation5]   ;;  %s3060_s23 = smov [#allocation8]  }
   0x5   :  { %s32_s22 = sshll.u32 %s3059_s21, 4  ;;  %s51_s24 = sshll.u32 %s3060_s23, 4  ;;  %s33_s22 = int_to_ptr.vmem [resolvable:$true] %s32_s22  ;;  %s52_s24 = int_to_ptr.vmem [resolvable:$true] %s51_s24 }
   0x6   :  { %s2917_s25 = scalar_lea.vmem %s33_s22, 64  ;;  %p2922_p1 = scmp.lt.s32.totalorder %s33_s22, %s33_s22 }
   0x7   :  { %p2918_p0 = scmp.ne.s32.totalorder %s33_s22, %s2917_s25  ;;  %p2923_p2 = scmp.lt.s32.totalorder %s2917_s25, %s2917_s25 }
   0x9   :  { %p2924_p3 = por %p2923_p2, %p2922_p1 }
   0xb   :  { %p2925_p4 = pnand %p2924_p3, %p2918_p0 }
   0xd   :  { %2928 = shalt.err (!%p2925_p4)
}
   0xe   :  { %35 = dma.hbm_to_vmem [thread:$0]  %s3787_s1, 64, %s33_s22, [#allocation6]  }
   0xf   :  { %s2937_s28 = scalar_lea.vmem %s52_s24, 2048  ;;  %p2942_p6 = scmp.lt.s32.totalorder %s52_s24, %s52_s24 }
  0x10   :  { %p2938_p5 = scmp.ne.s32.totalorder %s52_s24, %s2937_s28  ;;  %p2943_p7 = scmp.lt.s32.totalorder %s2937_s28, %s2937_s28 }
  0x12   :  { %p2944_p8 = por %p2943_p7, %p2942_p6 }
  0x14   :  { %p2945_p9 = pnand %p2944_p8, %p2938_p5 }
  0x16   :  { %2948 = shalt.err (!%p2945_p9)
}
  0x17   :  { %s3061_s29 = smov 128   ;;  %s3062_s30 = smov 8  }
  0x18   :  { %57 = dma.hbm_to_vmem [thread:$0]  %s3789_s3, 2048, %s52_s24, [#allocation9], %s3061_s29, %s3061_s29, %s3062_s30  }
  0x19   :  { %s3063_s9 = smov [#allocation2]   ;;  %s3064_s11 = smov [#allocation7]  }
  0x1a   :  { %s22_s10 = sshll.u32 %s3063_s9, 4  ;;  %s42_s12 = sshll.u32 %s3064_s11, 4  ;;  %s23_s10 = int_to_ptr.vmem [resolvable:$true] %s22_s10  ;;  %s43_s12 = int_to_ptr.vmem [resolvable:$true] %s42_s12 }
  0x1b   :  { %s2957_s1 = scalar_lea.vmem %s23_s10, 64  ;;  %p2962_p11 = scmp.lt.s32.totalorder %s23_s10, %s23_s10 }
  0x1c   :  { %p2958_p10 = scmp.ne.s32.totalorder %s23_s10, %s2957_s1  ;;  %p2963_p12 = scmp.lt.s32.totalorder %s2957_s1, %s2957_s1 }
  0x1e   :  { %p2964_p13 = por %p2963_p12, %p2962_p11 }
  0x20   :  { %p2965_p0 = pnand %p2964_p13, %p2958_p10 }
  0x22   :  { %2968 = shalt.err (!%p2965_p0)
}
  0x23   :  { %25 = dma.hbm_to_vmem [thread:$0]  %s3786_s0, 64, %s23_s10, [#allocation3]  }
  0x24   :  { %s2977_s15 = scalar_lea.vmem %s43_s12, 64  ;;  %p2982_p2 = scmp.lt.s32.totalorder %s43_s12, %s43_s12 }
  0x25   :  { %p2978_p1 = scmp.ne.s32.totalorder %s43_s12, %s2977_s15  ;;  %p2983_p3 = scmp.lt.s32.totalorder %s2977_s15, %s2977_s15 }
  0x27   :  { %p2984_p4 = por %p2983_p3, %p2982_p2 }
  0x29   :  { %p2985_p5 = pnand %p2984_p4, %p2978_p1 }
  0x2b   :  { %2988 = shalt.err (!%p2985_p5)
}
  0x2c   :  { %45 = dma.hbm_to_vmem [thread:$0]  %s3788_s2, 64, %s43_s12, [#allocation6]  }
  0x2d   :  { %s3065_s17 = smov [#allocation10]  }
  0x2e   :  { %s63_s18 = sshll.u32 %s3065_s17, 4  ;;  %s64_s18 = int_to_ptr.vmem [resolvable:$true] %s63_s18 }
  0x2f   :  { %s2997_s19 = scalar_lea.vmem %s64_s18, 4096  ;;  %p3002_p7 = scmp.lt.s32.totalorder %s64_s18, %s64_s18 }
  0x30   :  { %p2998_p6 = scmp.ne.s32.totalorder %s64_s18, %s2997_s19  ;;  %p3003_p8 = scmp.lt.s32.totalorder %s2997_s19, %s2997_s19 }
  0x32   :  { %p3004_p9 = por %p3003_p8, %p3002_p7 }
  0x34   :  { %p3005_p10 = pnand %p3004_p9, %p2998_p6 }
  0x36   :  { %3008 = shalt.err (!%p3005_p10)
}
  0x37   :  { %s3066_s0 = smov 256   ;;  %s3067_s20 = smov 16  }
  0x38   :  { %69 = dma.hbm_to_vmem [thread:$0]  %s3790_s4, 4096, %s64_s18, [#allocation9], %s3066_s0, %s3066_s0, %s3067_s20  }
  0x39   :  { %s3068_s23 = smov [#allocation11]  }
  0x3a   :  { %s75_s24 = sshll.u32 %s3068_s23, 4  ;;  %s76_s24 = int_to_ptr.vmem [resolvable:$true] %s75_s24 }
  0x3b   :  { %s3017_s2 = scalar_lea.vmem %s76_s24, 4096  ;;  %p3022_p12 = scmp.lt.s32.totalorder %s76_s24, %s76_s24 }
  0x3c   :  { %p3018_p11 = scmp.ne.s32.totalorder %s76_s24, %s3017_s2  ;;  %p3023_p13 = scmp.lt.s32.totalorder %s3017_s2, %s3017_s2 }
  0x3e   :  { %p3024_p0 = por %p3023_p13, %p3022_p12 }
  0x40   :  { %p3025_p1 = pnand %p3024_p0, %p3018_p11 }
  0x42   :  { %3028 = shalt.err (!%p3025_p1)
}
  0x43   :  { %s3069_s25 = smov 64   ;;  %s3070_s26 = smov 4  }
  0x44   :  { %81 = dma.hbm_to_vmem [thread:$0]  %s3791_s5, 4096, %s76_s24, [#allocation12], %s3069_s25, %s3069_s25, %s3070_s26  }
  0x45   :  { %3049 = dma.done.wait [#allocation3], 64  }
  0x46   :  { %3050 = vsyncadd [#allocation3], 4294967232 }
  0x47   :  { %3051 = dma.done.wait [#allocation6], 128  }
  0x48   :  { %3052 = vsyncadd [#allocation6], 4294967168 }
  0x49   :  { %3053 = dma.done.wait [#allocation9], 6144  }
  0x4a   :  { %3054 = vsyncadd [#allocation9], 4294961152 }
  0x4b   :  { %3055 = dma.done.wait [#allocation12], 4096  }
  0x4c   :  { %3056 = vsyncadd [#allocation12], 4294963200  ;;  %v3799_v0 = vmov 0.0   ;;  %vm3072_vm0 = vmmov 0   ;;  %v117_v1 = vld [vmem:[#allocation8 + $0x78] sm:$0xff]  ;;  %v116_v2 = vld [vmem:[#allocation8 + $0x70] sm:$0xff] }
  0x4d   :  { %2391 = vmatprep.subr.mxu0 %v3799_v0  ;;  %2426 = vmatprep.subr.mxu1 %v3799_v0  ;;  %v115_v3 = vld [vmem:[#allocation8 + $0x68] sm:$0xff]  ;;  %v3134_v4 = vand.u32 4294901760, %v117_v1  ;;  %v3136_v5 = vand.u32 4294901760, %v116_v2  ;;  %v114_v7 = vld [vmem:[#allocation8 + $0x60] sm:$0xff]  ;;  %v113_v8 = vld [vmem:[#allocation8 + $0x58] sm:$0xff]  ;;  %s3074_s4 = smov [#allocation13]  }
  0x4e   :  { %2423 = vmatprep.mubr.msk.f32.mxu0 %vm3072_vm0, %v3799_v0  ;;  %2458 = vmatprep.mubr.msk.f32.mxu1 %vm3072_vm0, %v3799_v0  ;;  %v3138_v6 = vand.u32 4294901760, %v115_v3  ;;  %v112_v9 = vld [vmem:[#allocation8 + $0x50] sm:$0xff]  ;;  %v3140_v10 = vand.u32 4294901760, %v114_v7  ;;  %v3142_v11 = vand.u32 4294901760, %v113_v8  ;;  %v111_v13 = vld [vmem:[#allocation8 + $0x48] sm:$0xff]  ;;  %v110_v14 = vld [vmem:[#allocation8 + $0x40] sm:$0xff] }
  0x4f   :  { %v3144_v12 = vand.u32 4294901760, %v112_v9  ;;  %2392 = vmatpush3.msra.mxu0 %v3134_v4  ;;  %v3148_v15 = vsub.f32 %v117_v1, %v3134_v4  ;;  %v3151_v16 = vsub.f32 %v116_v2, %v3136_v5  ;;  %v3153_v17 = vand.u32 4294901760, %v111_v13  ;;  %v109_v19 = vld [vmem:[#allocation8 + $0x38] sm:$0xff]  ;;  %v108_v22 = vld [vmem:[#allocation8 + $0x30] sm:$0xff]  ;;  %v107_v23 = vld [vmem:[#allocation8 + $0x28] sm:$0xff]  ;;  %s2067_s5 = sshll.u32 %s3074_s4, 4  ;;  %s2068_s5 = int_to_ptr.vmem [resolvable:$true] %s2067_s5 }
  0x50   :  { %v3156_v18 = vsub.f32 %v115_v3, %v3138_v6  ;;  %2393 = vmatprep.subr.mxu0 %v3799_v0  ;;  %v3160_v20 = vsub.f32 %v114_v7, %v3140_v10  ;;  %v3163_v21 = vsub.f32 %v113_v8, %v3142_v11  ;;  %v3175_v27 = vand.u32 4294901760, %v110_v14  ;;  %v106_v28 = vld [vmem:[#allocation8 + $0x20] sm:$0xff]  ;;  %v105_v33 = vld [vmem:[#allocation8 + $0x18] sm:$0xff]  ;;  %v104_v34 = vld [vmem:[#allocation8 + $0x10] sm:$0xff]  ;;  %s3029_s29 = scalar_lea.vmem %s2068_s5, 64  ;;  %p3034_p3 = scmp.lt.s32.totalorder %s2068_s5, %s2068_s5 }
  0x51   :  { %2394 = vmatpush3.msra.mxu0 %v3136_v5  ;;  %v3167_v24 = vand.u32 4294901760, %v3148_v15  ;;  %v3170_v25 = vand.u32 4294901760, %v3151_v16  ;;  %v3181_v30 = vand.u32 4294901760, %v109_v19  ;;  %v3187_v32 = vsub.f32 %v112_v9, %v3144_v12  ;;  %v103_v47 = vld [vmem:[#allocation8 + $0x8] sm:$0xff]  ;;  %v3219_v48 = vld [vmem:[#allocation2] sm:$0xf]  ;;  %p3030_p2 = scmp.ne.s32.totalorder %s2068_s5, %s3029_s29  ;;  %p3035_p4 = scmp.lt.s32.totalorder %s3029_s29, %s3029_s29 }
  0x52   :  { %v3173_v26 = vand.u32 4294901760, %v3156_v18  ;;  %2395 = vmatprep.subr.mxu0 %v3799_v0  ;;  %v3179_v29 = vand.u32 4294901760, %v3160_v20  ;;  %v3184_v31 = vand.u32 4294901760, %v3163_v21  ;;  %v3197_v38 = vsub.f32 %v111_v13, %v3153_v17  ;;  %3810 = vst [vmem:[#allocation21_spill] sm:$0xff] %v3219_v48  ;;  %v102_v52 = vld [vmem:[#allocation8] sm:$0xff] }
  0x53   :  { %2396 = vmatpush3.msra.mxu0 %v3138_v6  ;;  %v214_v35 = vsub.f32 %v3148_v15, %v3167_v24  ;;  %v221_v36 = vsub.f32 %v3151_v16, %v3170_v25  ;;  %v3204_v41 = vand.u32 4294901760, %v108_v22  ;;  %v3207_v42 = vand.u32 4294901760, %v3187_v32  ;;  %p3036_p5 = por %p3035_p4, %p3034_p3 }
  0x54   :  { %v228_v37 = vsub.f32 %v3156_v18, %v3173_v26  ;;  %2397 = vmatprep.subr.mxu0 %v3799_v0  ;;  %v235_v39 = vsub.f32 %v3160_v20, %v3179_v29  ;;  %v242_v40 = vsub.f32 %v3163_v21, %v3184_v31  ;;  %v3214_v45 = vand.u32 4294901760, %v107_v23 }
  0x55   :  { %2398 = vmatpush3.msra.mxu0 %v3140_v10  ;;  %v3210_v43 = vand.u32 4294901760, %v214_v35  ;;  %v3212_v44 = vand.u32 4294901760, %v221_v36  ;;  %v3217_v46 = vand.u32 4294901760, %v3197_v38  ;;  %v249_v49 = vsub.f32 %v3187_v32, %v3207_v42  ;;  %p3037_p6 = pnand %p3036_p5, %p3030_p2 }
  0x56   :  { %2399 = vmatprep.subr.mxu0 %v3799_v0  ;;  %v3224_v50 = vand.u32 4294901760, %v106_v28  ;;  %v3227_v51 = vsub.f32 %v110_v14, %v3175_v27  ;;  %v3231_v53 = vand.u32 4294901760, %v228_v37  ;;  %v3233_v54 = vand.u32 4294901760, %v105_v33 }
  0x57   :  { %3808 = vst [vmem:[#allocation19_spill] sm:$0xff] %v3210_v43  ;;  %3809 = vst [vmem:[#allocation20_spill] sm:$0xff] %v3212_v44  ;;  %2400 = vmatpush3.msra.mxu0 %v3142_v11  ;;  %2427 = vmatpush3.msra.mxu1 %v3210_v43  ;;  %v3236_v55 = vsub.f32 %v109_v19, %v3181_v30  ;;  %v3238_v56 = vand.u32 4294901760, %v104_v34  ;;  %v3242_v57 = vand.u32 4294901760, %v235_v39  ;;  %v3244_v58 = vand.u32 4294901760, %v242_v40 }
  0x58   :  { %3811 = vst [vmem:[#allocation22_spill] sm:$0xff] %v3231_v53  ;;  %2401 = vmatprep.subr.mxu0 %v3799_v0  ;;  %2428 = vmatprep.subr.mxu1 %v3799_v0  ;;  %v3247_v59 = vand.u32 4294901760, %v3227_v51  ;;  %v3250_v60 = vsub.f32 %v108_v22, %v3204_v41  ;;  %v3254_v61 = vand.u32 4294901760, %v249_v49  ;;  %v256_v62 = vsub.f32 %v3197_v38, %v3217_v46 }
  0x59   :  { %3812 = vst [vmem:[#allocation23_spill] sm:$0xff] %v3242_v57  ;;  %3813 = vst [vmem:[#allocation24_spill] sm:$0xff] %v3244_v58  ;;  %2402 = vmatpush3.msra.mxu0 %v3144_v12  ;;  %2429 = vmatpush3.msra.mxu1 %v3212_v44  ;;  %v3259_v63 = vand.u32 4294901760, %v3236_v55  ;;  %v3262_v1 = vsub.f32 %v107_v23, %v3214_v45  ;;  %v3269_v3 = vand.u32 4294901760, %v103_v47  ;;  %v3275_v8 = vand.u32 4294901760, %v3219_v48 }
  0x5a   :  { %3814 = vst [vmem:[#allocation25_spill] sm:$0xff] %v3254_v61  ;;  %2403 = vmatprep.subr.mxu0 %v3799_v0  ;;  %2430 = vmatprep.subr.mxu1 %v3799_v0  ;;  %v3267_v2 = vand.u32 4294901760, %v3250_v60  ;;  %v3272_v7 = vsub.f32 %v106_v28, %v3224_v50  ;;  %v3282_v13 = vand.u32 4294901760, %v102_v52  ;;  %v3285_v14 = vsub.f32 %v105_v33, %v3233_v54 }
  0x5b   :  { %2404 = vmatpush3.msra.mxu0 %v3153_v17  ;;  %2431 = vmatpush3.msra.mxu1 %v3231_v53  ;;  %v3280_v9 = vand.u32 4294901760, %v3262_v1  ;;  %v3288_v19 = vsub.f32 %v104_v34, %v3238_v56  ;;  %v263_v22 = vsub.f32 %v3227_v51, %v3247_v59  ;;  %v270_v23 = vsub.f32 %v3236_v55, %v3259_v63 }
  0x5c   :  { %2405 = vmatprep.subr.mxu0 %v3799_v0  ;;  %2432 = vmatprep.subr.mxu1 %v3799_v0  ;;  %v3297_v28 = vand.u32 4294901760, %v3272_v7  ;;  %v3301_v33 = vsub.f32 %v3219_v48, %v3275_v8  ;;  %v277_v34 = vsub.f32 %v3250_v60, %v3267_v2  ;;  %v3310_v36 = vand.u32 4294901760, %v3285_v14 }
  0x5d   :  { %2406 = vmatpush3.msra.mxu0 %v3175_v27  ;;  %2433 = vmatpush3.msra.mxu1 %v3242_v57  ;;  %v284_v35 = vsub.f32 %v3262_v1, %v3280_v9  ;;  %v3313_v37 = vand.u32 4294901760, %v3288_v19  ;;  %v3321_v49 = vsub.f32 %v103_v47, %v3269_v3  ;;  %v3325_v48 = vand.u32 4294901760, %v256_v62 }
  0x5e   :  { %3815 = vst [vmem:[#allocation26_spill] sm:$0xff] %v3310_v36  ;;  %2407 = vmatprep.subr.mxu0 %v3799_v0  ;;  %2434 = vmatprep.subr.mxu1 %v3799_v0  ;;  %v291_v39 = vsub.f32 %v3272_v7, %v3297_v28  ;;  %v298_v57 = vsub.f32 %v3285_v14, %v3310_v36  ;;  %v3334_v40 = vand.u32 4294901760, %v263_v22  ;;  %v3817_v47 = vand.u32 4294901760, %v3301_v33 }
  0x5f   :  { %3816 = vst [vmem:[#allocation27_spill] sm:$0xff] %v3313_v37  ;;  %2408 = vmatpush3.msra.mxu0 %v3181_v30  ;;  %2435 = vmatpush3.msra.mxu1 %v3244_v58  ;;  %v3330_v53 = vsub.f32 %v102_v52, %v3282_v13  ;;  %v305_v62 = vsub.f32 %v3288_v19, %v3313_v37  ;;  %v3342_v58 = vand.u32 4294901760, %v3321_v49  ;;  %v3346_v52 = vand.u32 4294901760, %v270_v23 }
  0x60   :  { %2409 = vmatprep.subr.mxu0 %v3799_v0  ;;  %2436 = vmatprep.subr.mxu1 %v3799_v0  ;;  %v203_v44 = vsub.f32 %v3301_v33, %v3817_v47  ;;  %v3348_v43 = vand.u32 4294901760, %v277_v34  ;;  %v3350_v22 = vand.u32 4294901760, %v284_v35  ;;  %v3820_v47 = vmov 0.0  }
  0x61   :  { %3818 = vst [vmem:[#allocation28_spill] sm:$0xff] %v3342_v58  ;;  %2410 = vmatpush3.msra.mxu0 %v3204_v41  ;;  %2437 = vmatpush3.msra.mxu1 %v3254_v61  ;;  %v3353_v0 = vand.u32 4294901760, %v3330_v53  ;;  %v3357_v37 = vand.u32 4294901760, %v291_v39  ;;  %v3359_v36 = vand.u32 4294901760, %v298_v57  ;;  %v312_v61 = vsub.f32 %v3321_v49, %v3342_v58 }
  0x62   :  { %2411 = vmatprep.subr.mxu0 %v3820_v47  ;;  %2438 = vmatprep.subr.mxu1 %v3820_v47  ;;  %v204_v34 = vand.u32 4294901760, %v203_v44  ;;  %v3369_v35 = vand.u32 4294901760, %v305_v62  ;;  %v3821_v44 = vand.u32 4294901760, %v3301_v33  ;;  %v3824_v62 = vld [vmem:[#allocation19_spill] sm:$0xff] }
  0x63   :  { %3819 = vst [vmem:[#allocation29_spill] sm:$0xff] %v3353_v0  ;;  %2412 = vmatpush3.msra.mxu0 %v3214_v45  ;;  %2439 = vmatpush3.msra.mxu1 %v3325_v48  ;;  %v319_v23 = vsub.f32 %v3330_v53, %v3353_v0  ;;  %v3373_v57 = vand.u32 4294901760, %v312_v61 }
  0x64   :  { %2413 = vmatprep.subr.mxu0 %v3820_v47  ;;  %2440 = vmatprep.subr.mxu1 %v3820_v47 }
  0x65   :  { %2414 = vmatpush3.msra.mxu0 %v3224_v50  ;;  %2441 = vmatpush3.msra.mxu1 %v3334_v40  ;;  %v3375_v39 = vand.u32 4294901760, %v319_v23  ;;  %v3822_v61 = vld [vmem:[#allocation26_spill] sm:$0xff]  ;;  %v3825_v23 = vld [vmem:[#allocation20_spill] sm:$0xff] }
  0x66   :  { %2415 = vmatprep.subr.mxu0 %v3820_v47  ;;  %2442 = vmatprep.subr.mxu1 %v3820_v47 }
  0x67   :  { %2416 = vmatpush3.msra.mxu0 %v3233_v54  ;;  %2443 = vmatpush3.msra.mxu1 %v3346_v52 }
  0x68   :  { %2417 = vmatprep.subr.mxu0 %v3820_v47  ;;  %2444 = vmatprep.subr.mxu1 %v3820_v47 }
  0x69   :  { %2418 = vmatpush3.msra.mxu0 %v3238_v56  ;;  %2445 = vmatpush3.msra.mxu1 %v3348_v43 }
  0x6a   :  { %2419 = vmatprep.subr.mxu0 %v3820_v47  ;;  %2446 = vmatprep.subr.mxu1 %v3820_v47 }
  0x6b   :  { %2420 = vmatpush3.msra.mxu0 %v3269_v3  ;;  %2447 = vmatpush3.msra.mxu1 %v3350_v22 }
  0x6c   :  { %2421 = vmatprep.subr.mxu0 %v3820_v47  ;;  %2448 = vmatprep.subr.mxu1 %v3820_v47 }
  0x6d   :  { %2422 = vmatpush3.msra.mxu0 %v3282_v13  ;;  %2449 = vmatpush3.msra.mxu1 %v3357_v37 }
  0x6e   :  { %2450 = vmatprep.subr.mxu1 %v3820_v47  ;;  %2461 = vmatprep.subr.mxu0 %v3820_v47 }
  0x6f   :  { %2424 = vmatmul.mubr.f32.vlgmr.msra.gmra.mxu0 %v204_v34  ;;  %2451 = vmatpush3.msra.mxu1 %v3359_v36  ;;  %v3826_v34 = vld [vmem:[#allocation22_spill] sm:$0xff] }
  0x70   :  { %2462 = vmatpush3.msra.mxu0 %v3148_v15  ;;  %2452 = vmatprep.subr.mxu1 %v3820_v47 }
  0x71   :  { %2463 = vmatprep.subr.mxu0 %v3820_v47  ;;  %2453 = vmatpush3.msra.mxu1 %v3369_v35 }
  0x72   :  { %2464 = vmatpush3.msra.mxu0 %v3151_v16  ;;  %2454 = vmatprep.subr.mxu1 %v3820_v47 }
  0x73   :  { %2465 = vmatprep.subr.mxu0 %v3820_v47  ;;  %2455 = vmatpush3.msra.mxu1 %v3373_v57 }
  0x74   :  { %2466 = vmatpush3.msra.mxu0 %v3156_v18  ;;  %2456 = vmatprep.subr.mxu1 %v3820_v47 }
  0x75   :  { %2467 = vmatprep.subr.mxu0 %v3820_v47  ;;  %2457 = vmatpush3.msra.mxu1 %v3375_v39 }
  0x76   :  { %2468 = vmatpush3.msra.mxu0 %v3160_v20  ;;  %2459 = vmatmul.mubr.f32.vlgmr.msra.gmra.mxu1 %v3275_v8 }
  0x77   :  { %2469 = vmatprep.subr.mxu0 %v3820_v47  ;;  %2496 = vmatprep.subr.mxu1 %v3820_v47 }
  0x78   :  { %2470 = vmatpush3.msra.mxu0 %v3163_v21  ;;  %2497 = vmatpush3.msra.mxu1 %v3134_v4 }
  0x79   :  { %2471 = vmatprep.subr.mxu0 %v3820_v47  ;;  %2498 = vmatprep.subr.mxu1 %v3820_v47 }
  0x7a   :  { %2472 = vmatpush3.msra.mxu0 %v3187_v32  ;;  %2499 = vmatpush3.msra.mxu1 %v3136_v5 }
  0x7b   :  { %2473 = vmatprep.subr.mxu0 %v3820_v47  ;;  %2500 = vmatprep.subr.mxu1 %v3820_v47 }
  0x7c   :  { %2474 = vmatpush3.msra.mxu0 %v3197_v38  ;;  %2501 = vmatpush3.msra.mxu1 %v3138_v6 }
  0x7d   :  { %2475 = vmatprep.subr.mxu0 %v3820_v47  ;;  %2502 = vmatprep.subr.mxu1 %v3820_v47 }
  0x7e   :  { %2476 = vmatpush3.msra.mxu0 %v3227_v51  ;;  %2503 = vmatpush3.msra.mxu1 %v3140_v10 }
  0x7f   :  { %2477 = vmatprep.subr.mxu0 %v3820_v47  ;;  %2504 = vmatprep.subr.mxu1 %v3820_v47 }
  0x80   :  { %2478 = vmatpush3.msra.mxu0 %v3236_v55  ;;  %2505 = vmatpush3.msra.mxu1 %v3142_v11 }
  0x81   :  { %2479 = vmatprep.subr.mxu0 %v3820_v47  ;;  %2506 = vmatprep.subr.mxu1 %v3820_v47 }
  0x82   :  { %2480 = vmatpush3.msra.mxu0 %v3250_v60  ;;  %2507 = vmatpush3.msra.mxu1 %v3144_v12 }
  0x83   :  { %2481 = vmatprep.subr.mxu0 %v3820_v47  ;;  %2508 = vmatprep.subr.mxu1 %v3820_v47 }
  0x84   :  { %2482 = vmatpush3.msra.mxu0 %v3262_v1  ;;  %2509 = vmatpush3.msra.mxu1 %v3153_v17 }
  0x85   :  { %2483 = vmatprep.subr.mxu0 %v3820_v47  ;;  %2510 = vmatprep.subr.mxu1 %v3820_v47 }
  0x86   :  { %2484 = vmatpush3.msra.mxu0 %v3272_v7  ;;  %2511 = vmatpush3.msra.mxu1 %v3175_v27 }
  0x87   :  { %2485 = vmatprep.subr.mxu0 %v3820_v47  ;;  %2512 = vmatprep.subr.mxu1 %v3820_v47 }
  0x88   :  { %2486 = vmatpush3.msra.mxu0 %v3285_v14  ;;  %2513 = vmatpush3.msra.mxu1 %v3181_v30 }
  0x89   :  { %2487 = vmatprep.subr.mxu0 %v3820_v47  ;;  %2514 = vmatprep.subr.mxu1 %v3820_v47 }
  0x8a   :  { %2488 = vmatpush3.msra.mxu0 %v3288_v19  ;;  %2515 = vmatpush3.msra.mxu1 %v3204_v41 }
  0x8b   :  { %2489 = vmatprep.subr.mxu0 %v3820_v47  ;;  %2516 = vmatprep.subr.mxu1 %v3820_v47 }
  0x8c   :  { %2490 = vmatpush3.msra.mxu0 %v3321_v49  ;;  %2517 = vmatpush3.msra.mxu1 %v3214_v45 }
  0x8d   :  { %2491 = vmatprep.subr.mxu0 %v3820_v47  ;;  %2518 = vmatprep.subr.mxu1 %v3820_v47 }
  0x8e   :  { %2492 = vmatpush3.msra.mxu0 %v3330_v53  ;;  %2493 = vmatprep.mubr.msk.f32.mxu0 %vm3072_vm0, %v3820_v47 }
  0x8f   :  { %2519 = vmatpush3.msra.mxu1 %v3224_v50  ;;  %2494 = vmatmul.mubr.f32.vlgmr.msra.gmra.mxu0 %v3301_v33  ;;  %v3823_v33 = vld [vmem:[#allocation27_spill] sm:$0xff] }
  0x90   :  { %2520 = vmatprep.subr.mxu1 %v3820_v47  ;;  %2531 = vmatprep.subr.mxu0 %v3820_v47 }
  0x91   :  { %2521 = vmatpush3.msra.mxu1 %v3233_v54  ;;  %2532 = vmatpush3.msra.mxu0 %v3167_v24 }
  0x92   :  { %2522 = vmatprep.subr.mxu1 %v3820_v47  ;;  %2533 = vmatprep.subr.mxu0 %v3820_v47 }
  0x93   :  { %2523 = vmatpush3.msra.mxu1 %v3238_v56  ;;  %2534 = vmatpush3.msra.mxu0 %v3170_v25 }
  0x94   :  { %2524 = vmatprep.subr.mxu1 %v3820_v47  ;;  %2535 = vmatprep.subr.mxu0 %v3820_v47 }
  0x95   :  { %2525 = vmatpush3.msra.mxu1 %v3269_v3  ;;  %2536 = vmatpush3.msra.mxu0 %v3173_v26 }
  0x96   :  { %2526 = vmatprep.subr.mxu1 %v3820_v47  ;;  %2537 = vmatprep.subr.mxu0 %v3820_v47 }
  0x97   :  { %2527 = vmatpush3.msra.mxu1 %v3282_v13  ;;  %2528 = vmatprep.mubr.msk.f32.mxu1 %vm3072_vm0, %v3820_v47 }
  0x98   :  { %2538 = vmatpush3.msra.mxu0 %v3179_v29  ;;  %2529 = vmatmul.mubr.f32.vlgmr.msra.gmra.mxu1 %v3821_v44  ;;  %v3828_v44 = vld [vmem:[#allocation24_spill] sm:$0xff] }
  0x99   :  { %2539 = vmatprep.subr.mxu0 %v3820_v47  ;;  %2566 = vmatprep.subr.mxu1 %v3820_v47 }
  0x9a   :  { %2540 = vmatpush3.msra.mxu0 %v3184_v31  ;;  %2567 = vmatpush3.msra.mxu1 %v3134_v4 }
  0x9b   :  { %2541 = vmatprep.subr.mxu0 %v3820_v47  ;;  %2568 = vmatprep.subr.mxu1 %v3820_v47 }
  0x9c   :  { %2542 = vmatpush3.msra.mxu0 %v3207_v42  ;;  %2569 = vmatpush3.msra.mxu1 %v3136_v5 }
  0x9d   :  { %2543 = vmatprep.subr.mxu0 %v3820_v47  ;;  %2570 = vmatprep.subr.mxu1 %v3820_v47 }
  0x9e   :  { %2544 = vmatpush3.msra.mxu0 %v3217_v46  ;;  %2571 = vmatpush3.msra.mxu1 %v3138_v6 }
  0x9f   :  { %2545 = vmatprep.subr.mxu0 %v3820_v47  ;;  %2572 = vmatprep.subr.mxu1 %v3820_v47 }
  0xa0   :  { %2546 = vmatpush3.msra.mxu0 %v3247_v59  ;;  %2573 = vmatpush3.msra.mxu1 %v3140_v10 }
  0xa1   :  { %2547 = vmatprep.subr.mxu0 %v3820_v47  ;;  %2574 = vmatprep.subr.mxu1 %v3820_v47 }
  0xa2   :  { %2548 = vmatpush3.msra.mxu0 %v3259_v63  ;;  %2575 = vmatpush3.msra.mxu1 %v3142_v11 }
  0xa3   :  { %2549 = vmatprep.subr.mxu0 %v3820_v47  ;;  %2576 = vmatprep.subr.mxu1 %v3820_v47 }
  0xa4   :  { %2550 = vmatpush3.msra.mxu0 %v3267_v2  ;;  %2577 = vmatpush3.msra.mxu1 %v3144_v12 }
  0xa5   :  { %2551 = vmatprep.subr.mxu0 %v3820_v47  ;;  %2578 = vmatprep.subr.mxu1 %v3820_v47 }
  0xa6   :  { %2552 = vmatpush3.msra.mxu0 %v3280_v9  ;;  %2579 = vmatpush3.msra.mxu1 %v3153_v17 }
  0xa7   :  { %2553 = vmatprep.subr.mxu0 %v3820_v47  ;;  %2580 = vmatprep.subr.mxu1 %v3820_v47 }
  0xa8   :  { %2554 = vmatpush3.msra.mxu0 %v3297_v28  ;;  %2581 = vmatpush3.msra.mxu1 %v3175_v27 }
  0xa9   :  { %2555 = vmatprep.subr.mxu0 %v3820_v47  ;;  %2582 = vmatprep.subr.mxu1 %v3820_v47 }
  0xaa   :  { %2556 = vmatpush3.msra.mxu0 %v3822_v61  ;;  %2583 = vmatpush3.msra.mxu1 %v3181_v30 }
  0xab   :  { %2557 = vmatprep.subr.mxu0 %v3820_v47  ;;  %2584 = vmatprep.subr.mxu1 %v3820_v47 }
  0xac   :  { %2558 = vmatpush3.msra.mxu0 %v3823_v33  ;;  %2585 = vmatpush3.msra.mxu1 %v3204_v41 }
  0xad   :  { %2559 = vmatprep.subr.mxu0 %v3820_v47  ;;  %2586 = vmatprep.subr.mxu1 %v3820_v47 }
  0xae   :  { %2560 = vmatpush3.msra.mxu0 %v3342_v58  ;;  %2587 = vmatpush3.msra.mxu1 %v3214_v45 }
  0xaf   :  { %2561 = vmatprep.subr.mxu0 %v3820_v47  ;;  %2588 = vmatprep.subr.mxu1 %v3820_v47 }
  0xb0   :  { %2562 = vmatpush3.msra.mxu0 %v3353_v0  ;;  %2563 = vmatprep.mubr.msk.f32.mxu0 %vm3072_vm0, %v3820_v47 }
  0xb1   :  { %2589 = vmatpush3.msra.mxu1 %v3224_v50  ;;  %2564 = vmatmul.mubr.f32.vlgmr.msra.gmra.mxu0 %v3275_v8 }
  0xb2   :  { %2590 = vmatprep.subr.mxu1 %v3820_v47  ;;  %2598 = vmatprep.mubr.msk.f32.mxu1 %vm3072_vm0, %v3820_v47 }
  0xb3   :  { %2591 = vmatpush3.msra.mxu1 %v3233_v54  ;;  %2601 = vmatprep.subr.mxu0 %v3820_v47 }
  0xb4   :  { %2592 = vmatprep.subr.mxu1 %v3820_v47  ;;  %2602 = vmatpush3.msra.mxu0 %v3134_v4 }
  0xb5   :  { %2593 = vmatpush3.msra.mxu1 %v3238_v56  ;;  %2603 = vmatprep.subr.mxu0 %v3820_v47 }
  0xb6   :  { %2594 = vmatprep.subr.mxu1 %v3820_v47  ;;  %2604 = vmatpush3.msra.mxu0 %v3136_v5 }
  0xb7   :  { %2595 = vmatpush3.msra.mxu1 %v3269_v3  ;;  %2605 = vmatprep.subr.mxu0 %v3820_v47 }
  0xb8   :  { %2596 = vmatprep.subr.mxu1 %v3820_v47  ;;  %2606 = vmatpush3.msra.mxu0 %v3138_v6 }
  0xb9   :  { %2597 = vmatpush3.msra.mxu1 %v3282_v13  ;;  %2607 = vmatprep.subr.mxu0 %v3820_v47 }
  0xba   :  { %2599 = vmatmul.mubr.f32.vlgmr.msra.gmra.mxu1 %v3275_v8  ;;  %2636 = vmatprep.subr.mxu1 %v3820_v47  ;;  %v3827_v8 = vld [vmem:[#allocation23_spill] sm:$0xff] }
  0xbb   :  { %2637 = vmatpush3.msra.mxu1 %v3824_v62  ;;  %2608 = vmatpush3.msra.mxu0 %v3140_v10  ;;  %v3829_v62 = vld [vmem:[#allocation25_spill] sm:$0xff] }
  0xbc   :  { %2638 = vmatprep.subr.mxu1 %v3820_v47  ;;  %2609 = vmatprep.subr.mxu0 %v3820_v47 }
  0xbd   :  { %2639 = vmatpush3.msra.mxu1 %v3825_v23  ;;  %2610 = vmatpush3.msra.mxu0 %v3142_v11 }
  0xbe   :  { %2640 = vmatprep.subr.mxu1 %v3820_v47  ;;  %2611 = vmatprep.subr.mxu0 %v3820_v47 }
  0xbf   :  { %2641 = vmatpush3.msra.mxu1 %v3826_v34  ;;  %2612 = vmatpush3.msra.mxu0 %v3144_v12 }
  0xc0   :  { %2642 = vmatprep.subr.mxu1 %v3820_v47  ;;  %2613 = vmatprep.subr.mxu0 %v3820_v47 }
  0xc1   :  { %2643 = vmatpush3.msra.mxu1 %v3827_v8  ;;  %2614 = vmatpush3.msra.mxu0 %v3153_v17 }
  0xc2   :  { %2644 = vmatprep.subr.mxu1 %v3820_v47  ;;  %2615 = vmatprep.subr.mxu0 %v3820_v47 }
  0xc3   :  { %2645 = vmatpush3.msra.mxu1 %v3828_v44  ;;  %2616 = vmatpush3.msra.mxu0 %v3175_v27 }
  0xc4   :  { %2646 = vmatprep.subr.mxu1 %v3820_v47  ;;  %2617 = vmatprep.subr.mxu0 %v3820_v47 }
  0xc5   :  { %2647 = vmatpush3.msra.mxu1 %v3829_v62  ;;  %2618 = vmatpush3.msra.mxu0 %v3181_v30 }
  0xc6   :  { %2648 = vmatprep.subr.mxu1 %v3820_v47  ;;  %2619 = vmatprep.subr.mxu0 %v3820_v47 }
  0xc7   :  { %2649 = vmatpush3.msra.mxu1 %v3325_v48  ;;  %2620 = vmatpush3.msra.mxu0 %v3204_v41 }
  0xc8   :  { %2650 = vmatprep.subr.mxu1 %v3820_v47  ;;  %2621 = vmatprep.subr.mxu0 %v3820_v47 }
  0xc9   :  { %2651 = vmatpush3.msra.mxu1 %v3334_v40  ;;  %2622 = vmatpush3.msra.mxu0 %v3214_v45 }
  0xca   :  { %2652 = vmatprep.subr.mxu1 %v3820_v47  ;;  %2623 = vmatprep.subr.mxu0 %v3820_v47 }
  0xcb   :  { %2653 = vmatpush3.msra.mxu1 %v3346_v52  ;;  %2624 = vmatpush3.msra.mxu0 %v3224_v50 }
  0xcc   :  { %2654 = vmatprep.subr.mxu1 %v3820_v47  ;;  %2625 = vmatprep.subr.mxu0 %v3820_v47 }
  0xcd   :  { %2655 = vmatpush3.msra.mxu1 %v3348_v43  ;;  %2668 = vmatprep.mubr.msk.f32.mxu1 %vm3072_vm0, %v3820_v47 }
  0xce   :  { %2656 = vmatprep.subr.mxu1 %v3820_v47  ;;  %2626 = vmatpush3.msra.mxu0 %v3233_v54 }
  0xcf   :  { %2657 = vmatpush3.msra.mxu1 %v3350_v22  ;;  %2627 = vmatprep.subr.mxu0 %v3820_v47 }
  0xd0   :  { %2658 = vmatprep.subr.mxu1 %v3820_v47  ;;  %2628 = vmatpush3.msra.mxu0 %v3238_v56 }
  0xd1   :  { %2659 = vmatpush3.msra.mxu1 %v3357_v37  ;;  %2629 = vmatprep.subr.mxu0 %v3820_v47 }
  0xd2   :  { %2660 = vmatprep.subr.mxu1 %v3820_v47  ;;  %2630 = vmatpush3.msra.mxu0 %v3269_v3 }
  0xd3   :  { %2661 = vmatpush3.msra.mxu1 %v3359_v36  ;;  %2631 = vmatprep.subr.mxu0 %v3820_v47 }
  0xd4   :  { %2662 = vmatprep.subr.mxu1 %v3820_v47  ;;  %2632 = vmatpush3.msra.mxu0 %v3282_v13 }
  0xd5   :  { %2663 = vmatpush3.msra.mxu1 %v3369_v35  ;;  %2633 = vmatprep.mubr.msk.f32.mxu0 %vm3072_vm0, %v3820_v47 }
  0xd6   :  { %2664 = vmatprep.subr.mxu1 %v3820_v47  ;;  %2671 = vmatprep.subr.mxu0 %v3820_v47 }
  0xd7   :  { %2665 = vmatpush3.msra.mxu1 %v3373_v57 }
  0xd8   :  { %2666 = vmatprep.subr.mxu1 %v3820_v47 }
  0xd9   :  { %2667 = vmatpush3.msra.mxu1 %v3375_v39  ;;  %v3830_v39 = vld [vmem:[#allocation21_spill] sm:$0xff] }
  0xda   :  { %2706 = vmatprep.subr.mxu1 %v3820_v47 }
 0x12f   :  { %v206_v43 = vpop.f32.mrf.mxu0 }
 0x131   :  { %v2425_v48 = vpop.f32.mrf.mxu0 }
 0x136   :  { %v357_v36 = vpop.f32.mrf.mxu1 }
 0x137   :  { %v358_v34 = vadd.f32 %v357_v36, %v206_v43 }
 0x138   :  { %v2460_v37 = vpop.f32.mrf.mxu1 }
 0x14f   :  { %v461_v40 = vpop.f32.mrf.mxu0 }
 0x150   :  { %v462_v44 = vadd.f32 %v461_v40, %v358_v34 }
 0x151   :  { %v2495_v52 = vpop.f32.mrf.mxu0 }
 0x158   :  { %v550_v22 = vpop.f32.mrf.mxu1 }
 0x159   :  { %v551_v62 = vadd.f32 %v550_v22, %v462_v44 }
 0x15a   :  { %v2530_v35 = vpop.f32.mrf.mxu1 }
 0x171   :  { %v669_v23 = vpop.f32.mrf.mxu0 }
 0x172   :  { %v670_v57 = vadd.f32 %v669_v23, %v551_v62 }
 0x173   :  { %v2565_v8 = vpop.f32.mrf.mxu0 }
 0x17a   :  { %v756_v0 = vpop.f32.mrf.mxu1 }
 0x17b   :  { %v757_v58 = vadd.f32 %v756_v0, %v670_v57 }
 0x17c   :  { %v2600_v33 = vpop.f32.mrf.mxu1 }
 0x17d   :  { %v3614_v61 = vsub.f32 %v3830_v39, %v757_v58 }
 0x17f   :  { %v761_v48 = vmul.f32 %v3614_v61, %v3614_v61 }
 0x181   :  { %v3618_v37 = vand.u32 4294901760, %v761_v48 }
 0x183   :  { %v3621_v52 = vsub.f32 %v761_v48, %v3618_v37  ;;  %2669 = vmatmul.mubr.f32.vlgmr.msra.gmra.mxu1 %v3618_v37  ;;  %v1405_v48 = vlaneseq }
 0x184   :  { %2707 = vmatpush3.msra.mxu1 %v3134_v4  ;;  %2738 = vmatprep.mubr.msk.f32.mxu1 %vm3072_vm0, %v3820_v47 }
 0x185   :  { %2708 = vmatprep.subr.mxu1 %v3820_v47  ;;  %v845_v0 = vand.u32 4294901760, %v3621_v52 }
 0x186   :  { %2709 = vmatpush3.msra.mxu1 %v3136_v5 }
 0x187   :  { %2710 = vmatprep.subr.mxu1 %v3820_v47  ;;  %v846_v58 = vsub.f32 %v3621_v52, %v845_v0 }
 0x188   :  { %2711 = vmatpush3.msra.mxu1 %v3138_v6 }
 0x189   :  { %2712 = vmatprep.subr.mxu1 %v3820_v47  ;;  %v847_v33 = vand.u32 4294901760, %v846_v58 }
 0x18a   :  { %2713 = vmatpush3.msra.mxu1 %v3140_v10 }
 0x18b   :  { %2714 = vmatprep.subr.mxu1 %v3820_v47  ;;  %2634 = vmatmul.mubr.f32.vlgmr.msra.gmra.mxu0 %v847_v33 }
 0x18c   :  { %2672 = vmatpush3.msra.mxu0 %v3148_v15  ;;  %2715 = vmatpush3.msra.mxu1 %v3142_v11  ;;  %v2827_v15 = vld [vmem:[#allocation10 + $0xe0] ss:$16 sps:$4 sm:$0xff]  }
 0x18d   :  { %2673 = vmatprep.subr.mxu0 %v3820_v47  ;;  %2716 = vmatprep.subr.mxu1 %v3820_v47 }
 0x18e   :  { %2674 = vmatpush3.msra.mxu0 %v3151_v16  ;;  %2717 = vmatpush3.msra.mxu1 %v3144_v12  ;;  %v2830_v16 = vld [vmem:[#allocation10 + $0xe8] ss:$16 sps:$4 sm:$0xff]  }
 0x18f   :  { %2675 = vmatprep.subr.mxu0 %v3820_v47  ;;  %2718 = vmatprep.subr.mxu1 %v3820_v47 }
 0x190   :  { %2676 = vmatpush3.msra.mxu0 %v3156_v18  ;;  %2719 = vmatpush3.msra.mxu1 %v3153_v17  ;;  %v2838_v18 = vld [vmem:[#allocation10 + $0xcc] ss:$16 sps:$4 sm:$0xff]  }
 0x191   :  { %2677 = vmatprep.subr.mxu0 %v3820_v47  ;;  %2720 = vmatprep.subr.mxu1 %v3820_v47 }
 0x192   :  { %2678 = vmatpush3.msra.mxu0 %v3160_v20  ;;  %2721 = vmatpush3.msra.mxu1 %v3175_v27  ;;  %v2833_v20 = vld [vmem:[#allocation10 + $0xc0] ss:$16 sps:$4 sm:$0xff]  }
 0x193   :  { %2679 = vmatprep.subr.mxu0 %v3820_v47  ;;  %2722 = vmatprep.subr.mxu1 %v3820_v47 }
 0x194   :  { %2680 = vmatpush3.msra.mxu0 %v3163_v21  ;;  %2723 = vmatpush3.msra.mxu1 %v3181_v30  ;;  %v2836_v21 = vld [vmem:[#allocation10 + $0xc8] ss:$16 sps:$4 sm:$0xff]  }
 0x195   :  { %2681 = vmatprep.subr.mxu0 %v3820_v47  ;;  %2724 = vmatprep.subr.mxu1 %v3820_v47 }
 0x196   :  { %2682 = vmatpush3.msra.mxu0 %v3187_v32  ;;  %2725 = vmatpush3.msra.mxu1 %v3204_v41  ;;  %v2850_v32 = vld [vmem:[#allocation10 + $0x8c] ss:$16 sps:$4 sm:$0xff]  }
 0x197   :  { %2683 = vmatprep.subr.mxu0 %v3820_v47  ;;  %2726 = vmatprep.subr.mxu1 %v3820_v47 }
 0x198   :  { %2684 = vmatpush3.msra.mxu0 %v3197_v38  ;;  %2727 = vmatpush3.msra.mxu1 %v3214_v45  ;;  %v2853_v38 = vld [vmem:[#allocation10 + $0x64] ss:$16 sps:$4 sm:$0xff]  }
 0x199   :  { %2685 = vmatprep.subr.mxu0 %v3820_v47  ;;  %2728 = vmatprep.subr.mxu1 %v3820_v47 }
 0x19a   :  { %2686 = vmatpush3.msra.mxu0 %v3227_v51  ;;  %2729 = vmatpush3.msra.mxu1 %v3224_v50  ;;  %v2857_v51 = vld [vmem:[#allocation10 + $0x40] ss:$16 sps:$4 sm:$0xff]  }
 0x19b   :  { %2687 = vmatprep.subr.mxu0 %v3820_v47  ;;  %2730 = vmatprep.subr.mxu1 %v3820_v47 }
 0x19c   :  { %2688 = vmatpush3.msra.mxu0 %v3236_v55  ;;  %2731 = vmatpush3.msra.mxu1 %v3233_v54  ;;  %v2865_v55 = vld [vmem:[#allocation10 + $0x24] ss:$16 sps:$4 sm:$0xff]  }
 0x19d   :  { %2689 = vmatprep.subr.mxu0 %v3820_v47  ;;  %2732 = vmatprep.subr.mxu1 %v3820_v47 }
 0x19e   :  { %2690 = vmatpush3.msra.mxu0 %v3250_v60  ;;  %2733 = vmatpush3.msra.mxu1 %v3238_v56  ;;  %v2866_v60 = vld [vmem:[#allocation10 + $0x28] ss:$16 sps:$4 sm:$0xff]  }
 0x19f   :  { %2691 = vmatprep.subr.mxu0 %v3820_v47  ;;  %2734 = vmatprep.subr.mxu1 %v3820_v47 }
 0x1a0   :  { %2692 = vmatpush3.msra.mxu0 %v3262_v1  ;;  %2735 = vmatpush3.msra.mxu1 %v3269_v3  ;;  %v2874_v1 = vld [vmem:[#allocation10 + $0xc] ss:$16 sps:$4 sm:$0xff]  }
 0x1a1   :  { %2693 = vmatprep.subr.mxu0 %v3820_v47  ;;  %2736 = vmatprep.subr.mxu1 %v3820_v47 }
 0x1a2   :  { %2694 = vmatpush3.msra.mxu0 %v3272_v7  ;;  %2737 = vmatpush3.msra.mxu1 %v3282_v13  ;;  %v2875_v7 = vld [vmem:[#allocation11 + $0x78] sm:$0xff]  }
 0x1a3   :  { %2695 = vmatprep.subr.mxu0 %v3820_v47  ;;  %2739 = vmatmul.mubr.f32.vlgmr.msra.gmra.mxu1 %v845_v0  ;;  %v3766_v0 = vld [vmem:[#allocation5] sm:$0x7] }
 0x1a4   :  { %2776 = vmatprep.subr.mxu1 %v3820_v47  ;;  %2696 = vmatpush3.msra.mxu0 %v3285_v14 }
 0x1a5   :  { %2777 = vmatpush3.msra.mxu1 %v3134_v4  ;;  %2697 = vmatprep.subr.mxu0 %v3820_v47  ;;  %v3831_v4 = vld [vmem:[#allocation26_spill] sm:$0xff] }
 0x1a6   :  { %2778 = vmatprep.subr.mxu1 %v3820_v47  ;;  %2698 = vmatpush3.msra.mxu0 %v3288_v19 }
 0x1a7   :  { %2779 = vmatpush3.msra.mxu1 %v3136_v5  ;;  %2699 = vmatprep.subr.mxu0 %v3820_v47  ;;  %v3832_v5 = vld [vmem:[#allocation27_spill] sm:$0xff] }
 0x1a8   :  { %2780 = vmatprep.subr.mxu1 %v3820_v47  ;;  %2700 = vmatpush3.msra.mxu0 %v3321_v49 }
 0x1a9   :  { %2781 = vmatpush3.msra.mxu1 %v3138_v6  ;;  %2701 = vmatprep.subr.mxu0 %v3820_v47  ;;  %v3833_v6 = vld [vmem:[#allocation28_spill] sm:$0xff] }
 0x1aa   :  { %2782 = vmatprep.subr.mxu1 %v3820_v47  ;;  %2702 = vmatpush3.msra.mxu0 %v3330_v53  ;;  %v3073_v53 = vmov 0  }
 0x1ab   :  { %2703 = vmatprep.mubr.msk.f32.mxu0 %vm3072_vm0, %v3820_v47  ;;  %2783 = vmatpush3.msra.mxu1 %v3140_v10  ;;  %v3834_v10 = vld [vmem:[#allocation29_spill] sm:$0xff] }
 0x1ac   :  { %2704 = vmatmul.mubr.f32.vlgmr.msra.gmra.mxu0 %v3621_v52  ;;  %2741 = vmatprep.subr.mxu0 %v3820_v47 }
 0x1ad   :  { %2784 = vmatprep.subr.mxu1 %v3820_v47  ;;  %2742 = vmatpush3.msra.mxu0 %v3167_v24  ;;  %v2841_v24 = vld [vmem:[#allocation10 + $0xa4] ss:$16 sps:$4 sm:$0xff]  }
 0x1ae   :  { %2785 = vmatpush3.msra.mxu1 %v3142_v11  ;;  %2743 = vmatprep.subr.mxu0 %v3820_v47  ;;  %v2829_v11 = vld [vmem:[#allocation10 + $0xe4] ss:$16 sps:$4 sm:$0xff]  }
 0x1af   :  { %2786 = vmatprep.subr.mxu1 %v3820_v47  ;;  %2744 = vmatpush3.msra.mxu0 %v3170_v25  ;;  %v2844_v25 = vld [vmem:[#allocation10 + $0xac] ss:$16 sps:$4 sm:$0xff]  }
 0x1b0   :  { %2787 = vmatpush3.msra.mxu1 %v3144_v12  ;;  %2745 = vmatprep.subr.mxu0 %v3820_v47  ;;  %v2832_v12 = vld [vmem:[#allocation10 + $0xec] ss:$16 sps:$4 sm:$0xff]  }
 0x1b1   :  { %2788 = vmatprep.subr.mxu1 %v3820_v47  ;;  %2746 = vmatpush3.msra.mxu0 %v3173_v26  ;;  %v2839_v26 = vld [vmem:[#allocation10 + $0xa0] ss:$16 sps:$4 sm:$0xff]  }
 0x1b2   :  { %2789 = vmatpush3.msra.mxu1 %v3153_v17  ;;  %2747 = vmatprep.subr.mxu0 %v3820_v47  ;;  %v2835_v17 = vld [vmem:[#allocation10 + $0xc4] ss:$16 sps:$4 sm:$0xff]  }
 0x1b3   :  { %2790 = vmatprep.subr.mxu1 %v3820_v47  ;;  %2748 = vmatpush3.msra.mxu0 %v3179_v29  ;;  %v2845_v29 = vld [vmem:[#allocation10 + $0x80] ss:$16 sps:$4 sm:$0xff]  }
 0x1b4   :  { %2791 = vmatpush3.msra.mxu1 %v3175_v27  ;;  %2749 = vmatprep.subr.mxu0 %v3820_v47  ;;  %v2842_v27 = vld [vmem:[#allocation10 + $0xa8] ss:$16 sps:$4 sm:$0xff]  }
 0x1b5   :  { %2792 = vmatprep.subr.mxu1 %v3820_v47  ;;  %2750 = vmatpush3.msra.mxu0 %v3184_v31  ;;  %v2848_v31 = vld [vmem:[#allocation10 + $0x88] ss:$16 sps:$4 sm:$0xff]  }
 0x1b6   :  { %2793 = vmatpush3.msra.mxu1 %v3181_v30  ;;  %2751 = vmatprep.subr.mxu0 %v3820_v47  ;;  %v2847_v30 = vld [vmem:[#allocation10 + $0x84] ss:$16 sps:$4 sm:$0xff]  }
 0x1b7   :  { %2794 = vmatprep.subr.mxu1 %v3820_v47  ;;  %2752 = vmatpush3.msra.mxu0 %v3207_v42  ;;  %v2851_v42 = vld [vmem:[#allocation10 + $0x60] ss:$16 sps:$4 sm:$0xff]  }
 0x1b8   :  { %2795 = vmatpush3.msra.mxu1 %v3204_v41  ;;  %2753 = vmatprep.subr.mxu0 %v3820_v47  ;;  %v2856_v41 = vld [vmem:[#allocation10 + $0x6c] ss:$16 sps:$4 sm:$0xff]  }
 0x1b9   :  { %2796 = vmatprep.subr.mxu1 %v3820_v47  ;;  %2754 = vmatpush3.msra.mxu0 %v3217_v46  ;;  %v2859_v46 = vld [vmem:[#allocation10 + $0x44] ss:$16 sps:$4 sm:$0xff]  }
 0x1ba   :  { %2797 = vmatpush3.msra.mxu1 %v3214_v45  ;;  %2755 = vmatprep.subr.mxu0 %v3820_v47  ;;  %v2854_v45 = vld [vmem:[#allocation10 + $0x68] ss:$16 sps:$4 sm:$0xff]  }
 0x1bb   :  { %2798 = vmatprep.subr.mxu1 %v3820_v47  ;;  %2756 = vmatpush3.msra.mxu0 %v3247_v59  ;;  %v2863_v59 = vld [vmem:[#allocation10 + $0x20] ss:$16 sps:$4 sm:$0xff]  }
 0x1bc   :  { %2799 = vmatpush3.msra.mxu1 %v3224_v50  ;;  %2757 = vmatprep.subr.mxu0 %v3820_v47  ;;  %v2862_v50 = vld [vmem:[#allocation10 + $0x4c] ss:$16 sps:$4 sm:$0xff]  }
 0x1bd   :  { %2800 = vmatprep.subr.mxu1 %v3820_v47  ;;  %2758 = vmatpush3.msra.mxu0 %v3259_v63  ;;  %v2871_v63 = vld [vmem:[#allocation10 + $0x4] ss:$16 sps:$4 sm:$0xff]  }
 0x1be   :  { %2801 = vmatpush3.msra.mxu1 %v3233_v54  ;;  %2759 = vmatprep.subr.mxu0 %v3820_v47  ;;  %v2860_v54 = vld [vmem:[#allocation10 + $0x48] ss:$16 sps:$4 sm:$0xff]  }
 0x1bf   :  { %2802 = vmatprep.subr.mxu1 %v3820_v47  ;;  %2760 = vmatpush3.msra.mxu0 %v3267_v2  ;;  %v2869_v2 = vld [vmem:[#allocation10] ss:$16 sps:$4 sm:$0xff]  }
 0x1c0   :  { %2803 = vmatpush3.msra.mxu1 %v3238_v56  ;;  %2761 = vmatprep.subr.mxu0 %v3820_v47  ;;  %v2868_v56 = vld [vmem:[#allocation10 + $0x2c] ss:$16 sps:$4 sm:$0xff]  }
 0x1c1   :  { %2804 = vmatprep.subr.mxu1 %v3820_v47  ;;  %2762 = vmatpush3.msra.mxu0 %v3280_v9  ;;  %v2876_v9 = vld [vmem:[#allocation11 + $0xf8] sm:$0xff]  }
 0x1c2   :  { %2805 = vmatpush3.msra.mxu1 %v3269_v3  ;;  %2763 = vmatprep.subr.mxu0 %v3820_v47  ;;  %v2872_v3 = vld [vmem:[#allocation10 + $0x8] ss:$16 sps:$4 sm:$0xff]  }
 0x1c3   :  { %2806 = vmatprep.subr.mxu1 %v3820_v47  ;;  %2764 = vmatpush3.msra.mxu0 %v3297_v28 }
 0x1c4   :  { %2807 = vmatpush3.msra.mxu1 %v3282_v13  ;;  %2808 = vmatprep.mubr.msk.f32.mxu1 %vm3072_vm0, %v3820_v47 }
 0x1c5   :  { %2765 = vmatprep.subr.mxu0 %v3820_v47  ;;  %2809 = vmatmul.mubr.f32.vlgmr.msra.gmra.mxu1 %v3618_v37 }
 0x1c6   :  { %2766 = vmatpush3.msra.mxu0 %v3831_v4  ;;  %2773 = vmatprep.mubr.msk.f32.mxu0 %vm3072_vm0, %v3820_v47 }
 0x1c7   :  { %2767 = vmatprep.subr.mxu0 %v3820_v47  ;;  %1671 = vmatprep.subr.bf16.mxu1 %v2832_v12  ;;  %v2877_v12 = vld [vmem:[#allocation11 + $0x38] sm:$0xff]  }
 0x1c8   :  { %2768 = vmatpush3.msra.mxu0 %v3832_v5  ;;  %1672 = vmatpush1.bf16.msra.mxu1 %v2830_v16 }
 0x1c9   :  { %2769 = vmatprep.subr.mxu0 %v3820_v47  ;;  %1673 = vmatprep.subr.bf16.mxu1 %v2838_v18  ;;  %v2880_v18 = vld [vmem:[#allocation11 + $0xf0] sm:$0xff]  }
 0x1ca   :  { %2770 = vmatpush3.msra.mxu0 %v3833_v6  ;;  %1703 = vmatprep.mubr.bf16.mxu1 %v3073_v53 }
 0x1cb   :  { %2771 = vmatprep.subr.mxu0 %v3820_v47 }
 0x1cc   :  { %2772 = vmatpush3.msra.mxu0 %v3834_v10  ;;  %1674 = vmatpush1.bf16.msra.mxu1 %v2836_v21  ;;  %v2882_v21 = vld [vmem:[#allocation11 + $0xb0] sm:$0xff]  }
 0x1cd   :  { %2774 = vmatmul.mubr.f32.vlgmr.msra.gmra.mxu0 %v3618_v37  ;;  %1630 = vmatprep.subr.bf16.mxu0 %v2829_v11  ;;  %v3763_v37 = vshrl.u32 %v1405_v48, 7 }
 0x1ce   :  { %1631 = vmatpush1.bf16.msra.mxu0 %v2827_v15  ;;  %1675 = vmatprep.subr.bf16.mxu1 %v2844_v25  ;;  %v2878_v15 = vld [vmem:[#allocation11 + $0xb8] sm:$0xff]   ;;  %v2885_v25 = vld [vmem:[#allocation11 + $0x28] sm:$0xff]  }
 0x1cf   :  { %1632 = vmatprep.subr.bf16.mxu0 %v2835_v17  ;;  %1662 = vmatprep.mubr.bf16.mxu0 %v3073_v53  ;;  %v1407_v52 = vsub.s32 0, %v3763_v37  ;;  %v1412_v58 = vsub.s32 1, %v3763_v37  ;;  %v2879_v17 = vld [vmem:[#allocation11 + $0x70] sm:$0xff]   ;;  %v2899_v53 = vld [vmem:[#allocation11 + $0x48] sm:$0xff]  }
 0x1d0   :  { %1676 = vmatpush1.bf16.msra.mxu1 %v2842_v27  ;;  %v2887_v27 = vld [vmem:[#allocation11 + $0x60] sm:$0xff]  }
 0x1d1   :  { %1677 = vmatprep.subr.bf16.mxu1 %v2850_v32  ;;  %v1408_v33 = vrot.slane %v3766_v0, %v1407_v52  ;;  %v1413_v6 = vrot.slane %v3766_v0, %v1412_v58  ;;  %v2891_v32 = vld [vmem:[#allocation11 + $0x58] sm:$0xff]  }
 0x1d2   :  { %1633 = vmatpush1.bf16.msra.mxu0 %v2833_v20  ;;  %v2881_v20 = vld [vmem:[#allocation11 + $0x30] sm:$0xff]  }
 0x1d3   :  { %1634 = vmatprep.subr.bf16.mxu0 %v2841_v24  ;;  %v2884_v24 = vld [vmem:[#allocation11 + $0xe8] sm:$0xff]  }
 0x1d4   :  { %1678 = vmatpush1.bf16.msra.mxu1 %v2848_v31  ;;  %v2890_v31 = vld [vmem:[#allocation11 + $0xa0] sm:$0xff]  }
 0x1d5   :  { %1679 = vmatprep.subr.bf16.mxu1 %v2856_v41  ;;  %v2893_v41 = vld [vmem:[#allocation11 + $0x18] sm:$0xff]  }
 0x1d6   :  { %1635 = vmatpush1.bf16.msra.mxu0 %v2839_v26  ;;  %v2886_v26 = vld [vmem:[#allocation11 + $0xa8] sm:$0xff]  }
 0x1d7   :  { %1636 = vmatprep.subr.bf16.mxu0 %v2847_v30  ;;  %v2889_v30 = vld [vmem:[#allocation11 + $0x20] sm:$0xff]  }
 0x1d8   :  { %1680 = vmatpush1.bf16.msra.mxu1 %v2854_v45  ;;  %v2895_v45 = vld [vmem:[#allocation11 + $0x50] sm:$0xff]  }
 0x1d9   :  { %1681 = vmatprep.subr.bf16.mxu1 %v2862_v50  ;;  %v2897_v50 = vld [vmem:[#allocation11 + $0x10] sm:$0xff]  }
 0x1da   :  { %1637 = vmatpush1.bf16.msra.mxu0 %v2845_v29  ;;  %v2888_v29 = vld [vmem:[#allocation11 + $0xe0] sm:$0xff]  }
 0x1db   :  { %1638 = vmatprep.subr.bf16.mxu0 %v2853_v38  ;;  %v2892_v38 = vld [vmem:[#allocation11 + $0xd8] sm:$0xff]  }
 0x1dc   :  { %1682 = vmatpush1.bf16.msra.mxu1 %v2860_v54  ;;  %v2900_v54 = vld [vmem:[#allocation11 + $0xc8] sm:$0xff]  }
 0x1dd   :  { %1683 = vmatprep.subr.bf16.mxu1 %v2868_v56  ;;  %v2902_v56 = vld [vmem:[#allocation11 + $0x88] sm:$0xff]  }
 0x1de   :  { %1639 = vmatpush1.bf16.msra.mxu0 %v2851_v42  ;;  %v2894_v42 = vld [vmem:[#allocation11 + $0x98] sm:$0xff]  }
 0x1df   :  { %1640 = vmatprep.subr.bf16.mxu0 %v2859_v46  ;;  %v2896_v46 = vld [vmem:[#allocation11 + $0xd0] sm:$0xff]  }
 0x1e0   :  { %1684 = vmatpush1.bf16.msra.mxu1 %v2866_v60  ;;  %v2904_v60 = vld [vmem:[#allocation11 + $0xc0] sm:$0xff]  }
 0x1e1   :  { %1685 = vmatprep.subr.bf16.mxu1 %v2874_v1  ;;  %v2906_v1 = vld [vmem:[#allocation11 + $0x80] sm:$0xff]  }
 0x1e2   :  { %1641 = vmatpush1.bf16.msra.mxu0 %v2857_v51  ;;  %v2898_v51 = vld [vmem:[#allocation11 + $0x90] sm:$0xff]  }
 0x1e3   :  { %1642 = vmatprep.subr.bf16.mxu0 %v2865_v55  ;;  %v2901_v55 = vld [vmem:[#allocation11 + $0x8] sm:$0xff]  }
 0x1e4   :  { %1686 = vmatpush1.bf16.msra.mxu1 %v2872_v3  ;;  %v1448_v3 = vld [vmem:[#allocation7] sm:$0xf] }
 0x1e5   :  { %2369 = vmatprep.subr.bf16.mxu1 %v2876_v9  ;;  %v1453_v9 = vrot.slane %v1448_v3, %v1407_v52 }
 0x1e6   :  { %1643 = vmatpush1.bf16.msra.mxu0 %v2863_v59  ;;  %v2903_v59 = vld [vmem:[#allocation11 + $0x40] sm:$0xff]  }
 0x1e7   :  { %1644 = vmatprep.subr.bf16.mxu0 %v2871_v63  ;;  %v2905_v63 = vld [vmem:[#allocation11] sm:$0xff]  }
 0x1ea   :  { %1645 = vmatpush1.bf16.msra.mxu0 %v2869_v2  ;;  %v1460_v2 = vsub.s32 2, %v3763_v37 }
 0x1eb   :  { %2347 = vmatprep.subr.bf16.mxu0 %v2875_v7  ;;  %v1464_v7 = vsub.s32 3, %v3763_v37 }
 0x243   :  { %v1000_v13 = vpop.f32.mrf.mxu1 }
 0x245   :  { %v2670_v14 = vpop.f32.mrf.mxu1 }
 0x246   :  { %v1457_v14 = vrot.slane %v1448_v3, %v1412_v58 }
 0x24b   :  { %v849_v19 = vpop.f32.mrf.mxu0 }
 0x24c   :  { %v850_v40 = vadd.f32 1e-05, %v849_v19  ;;  %v1465_v19 = vrot.slane %v1448_v3, %v1464_v7 }
 0x24d   :  { %v2635_v28 = vpop.f32.mrf.mxu0 }
 0x24e   :  { %v1001_v35 = vadd.f32 %v1000_v13, %v850_v40  ;;  %v1461_v13 = vrot.slane %v1448_v3, %v1460_v2 }
 0x263   :  { %v1193_v49 = vpop.f32.mrf.mxu1 }
 0x265   :  { %v2740_v47 = vpop.f32.mrf.mxu1 }
 0x26c   :  { %v1104_v43 = vpop.f32.mrf.mxu0 }
 0x26d   :  { %v1105_v34 = vadd.f32 %v1104_v43, %v1001_v35 }
 0x26e   :  { %v2705_v36 = vpop.f32.mrf.mxu0 }
 0x26f   :  { %v1194_v8 = vadd.f32 %v1193_v49, %v1105_v34 }
 0x285   :  { %v1399_v22 = vpop.f32.mrf.mxu1 }
 0x287   :  { %v2810_v23 = vpop.f32.mrf.mxu1 }
 0x28d   :  { %v1312_v44 = vpop.f32.mrf.mxu0 }
 0x28e   :  { %v1313_v62 = vadd.f32 %v1312_v44, %v1194_v8 }
 0x28f   :  { %v2775_v57 = vpop.f32.mrf.mxu0 }
 0x290   :  { %v1400_v39 = vadd.f32 %v1399_v22, %v1313_v62 }
 0x292   :  { %2907 = vrsqrt.f32 %v1400_v39 }
 0x29f   :  { %v2908_v4 = vpop.eup %2907 }
 0x2a0   :  { %v1404_v5 = vmul.f32 %v2908_v4, %v3614_v61  ;;  %v2883_v61 = vld [vmem:[#allocation11 + $0x68] sm:$0xff]  }
 0x2a2   :  { %v1409_v10 = vmul.f32 %v1408_v33, %v1404_v5 }
 0x2a4   :  { %v1414_v11 = vadd.f32 %v1413_v6, %v1409_v10  ;;  %v1787_v6 = vrot.slane %v3766_v0, %v1460_v2 }
 0x2a6   :  { %v1415_v16 = vpack.c.bf16 %v1414_v11, %v1414_v11 }
 0x2a8   :  { %1663 = vmatmul.mubr.bf16.vlgmr.msra.gmra.mxu0 %v1415_v16  ;;  %1704 = vmatmul.mubr.bf16.vlgmr.msra.gmra.mxu1 %v1415_v16 }
 0x2a9   :  { %2348 = vmatpush3.bf16.msra.mxu0 %v2877_v12  ;;  %2370 = vmatpush3.bf16.msra.mxu1 %v2878_v15 }
 0x2aa   :  { %2349 = vmatprep.subr.bf16.mxu0 %v2879_v17  ;;  %2371 = vmatprep.subr.bf16.mxu1 %v2880_v18 }
 0x2ad   :  { %2350 = vmatpush3.bf16.msra.mxu0 %v2881_v20  ;;  %2372 = vmatpush3.bf16.msra.mxu1 %v2882_v21 }
 0x2ae   :  { %2351 = vmatprep.subr.bf16.mxu0 %v2883_v61  ;;  %2373 = vmatprep.subr.bf16.mxu1 %v2884_v24 }
 0x2b1   :  { %2352 = vmatpush3.bf16.msra.mxu0 %v2885_v25  ;;  %2374 = vmatpush3.bf16.msra.mxu1 %v2886_v26 }
 0x2b2   :  { %2353 = vmatprep.subr.bf16.mxu0 %v2887_v27  ;;  %2375 = vmatprep.subr.bf16.mxu1 %v2888_v29 }
 0x2b5   :  { %2354 = vmatpush3.bf16.msra.mxu0 %v2889_v30  ;;  %2376 = vmatpush3.bf16.msra.mxu1 %v2890_v31 }
 0x2b6   :  { %2355 = vmatprep.subr.bf16.mxu0 %v2891_v32  ;;  %2377 = vmatprep.subr.bf16.mxu1 %v2892_v38 }
 0x2b9   :  { %2356 = vmatpush3.bf16.msra.mxu0 %v2893_v41  ;;  %2378 = vmatpush3.bf16.msra.mxu1 %v2894_v42 }
 0x2ba   :  { %2357 = vmatprep.subr.bf16.mxu0 %v2895_v45  ;;  %2379 = vmatprep.subr.bf16.mxu1 %v2896_v46 }
 0x2bd   :  { %2358 = vmatpush3.bf16.msra.mxu0 %v2897_v50  ;;  %2380 = vmatpush3.bf16.msra.mxu1 %v2898_v51 }
 0x2be   :  { %2359 = vmatprep.subr.bf16.mxu0 %v2899_v53  ;;  %2381 = vmatprep.subr.bf16.mxu1 %v2900_v54 }
 0x2c1   :  { %2360 = vmatpush3.bf16.msra.mxu0 %v2901_v55  ;;  %2382 = vmatpush3.bf16.msra.mxu1 %v2902_v56 }
 0x2c2   :  { %2361 = vmatprep.subr.bf16.mxu0 %v2903_v59  ;;  %2383 = vmatprep.subr.bf16.mxu1 %v2904_v60 }
 0x2c5   :  { %2362 = vmatpush3.bf16.msra.mxu0 %v2905_v63  ;;  %2384 = vmatpush3.bf16.msra.mxu1 %v2906_v1 }
 0x368   :  { %v1664_v28 = vpop.f32.mrf.mxu0  ;;  %v1705_v49 = vpop.f32.mrf.mxu1 }
 0x369   :  { %v1665_v47 = vadd.f32 %v1664_v28, %v1453_v9  ;;  %v1706_v43 = vadd.f32 %v1705_v49, %v1461_v13 }
 0x36a   :  { %v1666_v36 = vpop.f32.mrf.mxu0  ;;  %v1707_v40 = vpop.f32.mrf.mxu1 }
 0x36b   :  { %v1667_v22 = vadd.f32 %v1666_v36, %v1457_v14  ;;  %v1708_v35 = vadd.f32 %v1707_v40, %v1465_v19  ;;  %v1712_v23 = vmax.f32 %v1665_v47, 0.0  ;;  %v1714_v34 = vmax.f32 %v1706_v43, 0.0 }
 0x36c   :  { %v1668_v8 = vpop.f32.mrf.mxu0  ;;  %v1709_v44 = vpop.f32.mrf.mxu1 }
 0x36d   :  { %v1713_v62 = vmax.f32 %v1667_v22, 0.0  ;;  %v1715_v57 = vmax.f32 %v1708_v35, 0.0  ;;  %v1716_v58 = vpack.c.bf16 %v1712_v23, %v1712_v23  ;;  %v1718_v33 = vpack.c.bf16 %v1714_v34, %v1714_v34 }
 0x36e   :  { %v1669_v39 = vpop.f32.mrf.mxu0  ;;  %v1710_v48 = vpop.f32.mrf.mxu1 }
 0x36f   :  { %v1717_v52 = vpack.c.bf16 %v1713_v62, %v1713_v62  ;;  %v1719_v37 = vpack.c.bf16 %v1715_v57, %v1715_v57 }
 0x371   :  { %2012 = vmatprep.mubr.bf16.mxu0 %v1717_v52  ;;  %2052 = vmatprep.mubr.bf16.mxu1 %v1719_v37 }
 0x372   :  { %2013 = vmatmul.mubr.bf16.vlgmr.msra.gmra.mxu0 %v1716_v58  ;;  %2053 = vmatmul.mubr.bf16.vlgmr.msra.gmra.mxu1 %v1718_v33 }
 0x432   :  { %v2363_v4 = vpop.f32.mrf.mxu0  ;;  %v2385_v5 = vpop.f32.mrf.mxu1 }
 0x434   :  { %v2364_v10 = vpop.f32.mrf.mxu0  ;;  %v2386_v11 = vpop.f32.mrf.mxu1 }
 0x435   :  { %v2365_v12 = vadd.f32 %v2364_v10, %v2363_v4  ;;  %v2387_v18 = vadd.f32 %v2386_v11, %v2385_v5 }
 0x436   :  { %v2366_v15 = vpop.f32.mrf.mxu0  ;;  %v2388_v16 = vpop.f32.mrf.mxu1 }
 0x437   :  { %v2015_v17 = vadd.f32 %v2365_v12, %v1787_v6 }
 0x438   :  { %v2367_v20 = vpop.f32.mrf.mxu0  ;;  %v2389_v21 = vpop.f32.mrf.mxu1 }
 0x439   :  { %v2055_v61 = vadd.f32 %v2387_v18, %v2015_v17 }
 0x43b   :  { %2060 = vst [vmem:[#allocation13] sm:$0xf] %v2055_v61 }
 0x43c   :  { %3040 = shalt.err (!%p3037_p6)
}
 0x43d   :  { %2070 = dma.vmem_to_hbm [thread:$0]  %s2068_s5, 64, %s3792_s6, [#allocation4]  }
 0x43e   :  { %3057 = dma.done.wait [#allocation4], 64  }
 0x43f   :  { %3058 = vsyncadd [#allocation4], 4294967232 }
 0x440   :  { %2074 = vsyncpa [#allocation3], 1 }
 0x441   :  { %2075 = vsyncpa [#allocation6], 1 }
 0x442   :  { %2076 = vsyncpa [#allocation9], 1 }
 0x443   :  { %2077 = vsyncpa [#allocation12], 1 }
 0x444   :  { %2078 = vsyncpa [#allocation4], 1 }

// kernel: tpu_custom_call.1
= control target key start
LH: loop header
LB: loop body
LE: loop exit
PB: predicated region body
PF: predicated region fallthrough
CT: control target
= control target key end

     0   :  { %11 = vsyncpa [#allocation3], 0  ;;  %s3786_s0 = inlined_call_operand.hbm [shape: f32[4,128], index: 0, kind: input, shape index: {}]   ;;  %s3787_s1 = inlined_call_operand.hbm [shape: f32[3,128], index: 1, kind: input, shape index: {}]   ;;  %s3788_s2 = inlined_call_operand.hbm [shape: f32[1,512], index: 2, kind: input, shape index: {}]   ;;  %s3789_s3 = inlined_call_operand.hbm [shape: f32[128,128], index: 3, kind: input, shape index: {}]   ;;  %s3790_s4 = inlined_call_operand.hbm [shape: bf16[128,512], index: 4, kind: input, shape index: {}]   ;;  %s3791_s5 = inlined_call_operand.hbm [shape: bf16[512,128], index: 5, kind: input, shape index: {}]   ;;  %s3792_s6 = inlined_call_operand.hbm [shape: f32[4,128], index: 6, kind: output, shape index: {}]  }
   0x1   :  { %12 = vsyncpa [#allocation6], 0 }
   0x2   :  { %13 = vsyncpa [#allocation9], 0 }
   0x3   :  { %14 = vsyncpa [#allocation12], 0 }
   0x4   :  { %15 = vsyncpa [#allocation4], 0  ;;  %s3059_s21 = smov [#allocation5]   ;;  %s3060_s23 = smov [#allocation8]  }
   0x5   :  { %s32_s22 = sshll.u32 %s3059_s21, 4  ;;  %s51_s24 = sshll.u32 %s3060_s23, 4  ;;  %s33_s22 = int_to_ptr.vmem [resolvable:$true] %s32_s22  ;;  %s52_s24 = int_to_ptr.vmem [resolvable:$true] %s51_s24 }
   0x6   :  { %s2917_s25 = scalar_lea.vmem %s33_s22, 64  ;;  %p2922_p1 = scmp.lt.s32.totalorder %s33_s22, %s33_s22 }
   0x7   :  { %p2918_p0 = scmp.ne.s32.totalorder %s33_s22, %s2917_s25  ;;  %p2923_p2 = scmp.lt.s32.totalorder %s2917_s25, %s2917_s25 }
   0x9   :  { %p2924_p3 = por %p2923_p2, %p2922_p1 }
   0xb   :  { %p2925_p4 = pnand %p2924_p3, %p2918_p0 }
   0xd   :  { %2928 = shalt.err (!%p2925_p4)
}
   0xe   :  { %35 = dma.hbm_to_vmem [thread:$0]  %s3787_s1, 64, %s33_s22, [#allocation6]  }
   0xf   :  { %s2937_s28 = scalar_lea.vmem %s52_s24, 2048  ;;  %p2942_p6 = scmp.lt.s32.totalorder %s52_s24, %s52_s24 }
  0x10   :  { %p2938_p5 = scmp.ne.s32.totalorder %s52_s24, %s2937_s28  ;;  %p2943_p7 = scmp.lt.s32.totalorder %s2937_s28, %s2937_s28 }
  0x12   :  { %p2944_p8 = por %p2943_p7, %p2942_p6 }
  0x14   :  { %p2945_p9 = pnand %p2944_p8, %p2938_p5 }
  0x16   :  { %2948 = shalt.err (!%p2945_p9)
}
  0x17   :  { %s3061_s29 = smov 128   ;;  %s3062_s30 = smov 8  }
  0x18   :  { %57 = dma.hbm_to_vmem [thread:$0]  %s3789_s3, 2048, %s52_s24, [#allocation9], %s3061_s29, %s3061_s29, %s3062_s30  }
  0x19   :  { %s3063_s9 = smov [#allocation2]   ;;  %s3064_s11 = smov [#allocation7]  }
  0x1a   :  { %s22_s10 = sshll.u32 %s3063_s9, 4  ;;  %s42_s12 = sshll.u32 %s3064_s11, 4  ;;  %s23_s10 = int_to_ptr.vmem [resolvable:$true] %s22_s10  ;;  %s43_s12 = int_to_ptr.vmem [resolvable:$true] %s42_s12 }
  0x1b   :  { %s2957_s1 = scalar_lea.vmem %s23_s10, 64  ;;  %p2962_p11 = scmp.lt.s32.totalorder %s23_s10, %s23_s10 }
  0x1c   :  { %p2958_p10 = scmp.ne.s32.totalorder %s23_s10, %s2957_s1  ;;  %p2963_p12 = scmp.lt.s32.totalorder %s2957_s1, %s2957_s1 }
  0x1e   :  { %p2964_p13 = por %p2963_p12, %p2962_p11 }
  0x20   :  { %p2965_p0 = pnand %p2964_p13, %p2958_p10 }
  0x22   :  { %2968 = shalt.err (!%p2965_p0)
}
  0x23   :  { %25 = dma.hbm_to_vmem [thread:$0]  %s3786_s0, 64, %s23_s10, [#allocation3]  }
  0x24   :  { %s2977_s15 = scalar_lea.vmem %s43_s12, 64  ;;  %p2982_p2 = scmp.lt.s32.totalorder %s43_s12, %s43_s12 }
  0x25   :  { %p2978_p1 = scmp.ne.s32.totalorder %s43_s12, %s2977_s15  ;;  %p2983_p3 = scmp.lt.s32.totalorder %s2977_s15, %s2977_s15 }
  0x27   :  { %p2984_p4 = por %p2983_p3, %p2982_p2 }
  0x29   :  { %p2985_p5 = pnand %p2984_p4, %p2978_p1 }
  0x2b   :  { %2988 = shalt.err (!%p2985_p5)
}
  0x2c   :  { %45 = dma.hbm_to_vmem [thread:$0]  %s3788_s2, 64, %s43_s12, [#allocation6]  }
  0x2d   :  { %s3065_s17 = smov [#allocation10]  }
  0x2e   :  { %s63_s18 = sshll.u32 %s3065_s17, 4  ;;  %s64_s18 = int_to_ptr.vmem [resolvable:$true] %s63_s18 }
  0x2f   :  { %s2997_s19 = scalar_lea.vmem %s64_s18, 4096  ;;  %p3002_p7 = scmp.lt.s32.totalorder %s64_s18, %s64_s18 }
  0x30   :  { %p2998_p6 = scmp.ne.s32.totalorder %s64_s18, %s2997_s19  ;;  %p3003_p8 = scmp.lt.s32.totalorder %s2997_s19, %s2997_s19 }
  0x32   :  { %p3004_p9 = por %p3003_p8, %p3002_p7 }
  0x34   :  { %p3005_p10 = pnand %p3004_p9, %p2998_p6 }
  0x36   :  { %3008 = shalt.err (!%p3005_p10)
}
  0x37   :  { %s3066_s0 = smov 256   ;;  %s3067_s20 = smov 16  }
  0x38   :  { %69 = dma.hbm_to_vmem [thread:$0]  %s3790_s4, 4096, %s64_s18, [#allocation9], %s3066_s0, %s3066_s0, %s3067_s20  }
  0x39   :  { %s3068_s23 = smov [#allocation11]  }
  0x3a   :  { %s75_s24 = sshll.u32 %s3068_s23, 4  ;;  %s76_s24 = int_to_ptr.vmem [resolvable:$true] %s75_s24 }
  0x3b   :  { %s3017_s2 = scalar_lea.vmem %s76_s24, 4096  ;;  %p3022_p12 = scmp.lt.s32.totalorder %s76_s24, %s76_s24 }
  0x3c   :  { %p3018_p11 = scmp.ne.s32.totalorder %s76_s24, %s3017_s2  ;;  %p3023_p13 = scmp.lt.s32.totalorder %s3017_s2, %s3017_s2 }
  0x3e   :  { %p3024_p0 = por %p3023_p13, %p3022_p12 }
  0x40   :  { %p3025_p1 = pnand %p3024_p0, %p3018_p11 }
  0x42   :  { %3028 = shalt.err (!%p3025_p1)
}
  0x43   :  { %s3069_s25 = smov 64   ;;  %s3070_s26 = smov 4  }
  0x44   :  { %81 = dma.hbm_to_vmem [thread:$0]  %s3791_s5, 4096, %s76_s24, [#allocation12], %s3069_s25, %s3069_s25, %s3070_s26  }
  0x45   :  { %3049 = dma.done.wait [#allocation3], 64  }
  0x46   :  { %3050 = vsyncadd [#allocation3], 4294967232 }
  0x47   :  { %3051 = dma.done.wait [#allocation6], 128  }
  0x48   :  { %3052 = vsyncadd [#allocation6], 4294967168 }
  0x49   :  { %3053 = dma.done.wait [#allocation9], 6144  }
  0x4a   :  { %3054 = vsyncadd [#allocation9], 4294961152 }
  0x4b   :  { %3055 = dma.done.wait [#allocation12], 4096  }
  0x4c   :  { %3056 = vsyncadd [#allocation12], 4294963200  ;;  %v3799_v0 = vmov 0.0   ;;  %vm3072_vm0 = vmmov 0   ;;  %v117_v1 = vld [vmem:[#allocation8 + $0x78] sm:$0xff]  ;;  %v116_v2 = vld [vmem:[#allocation8 + $0x70] sm:$0xff] }
  0x4d   :  { %2391 = vmatprep.subr.mxu0 %v3799_v0  ;;  %2426 = vmatprep.subr.mxu1 %v3799_v0  ;;  %v115_v3 = vld [vmem:[#allocation8 + $0x68] sm:$0xff]  ;;  %v3134_v4 = vand.u32 4294901760, %v117_v1  ;;  %v3136_v5 = vand.u32 4294901760, %v116_v2  ;;  %v114_v7 = vld [vmem:[#allocation8 + $0x60] sm:$0xff]  ;;  %v113_v8 = vld [vmem:[#allocation8 + $0x58] sm:$0xff]  ;;  %s3074_s4 = smov [#allocation13]  }
  0x4e   :  { %2423 = vmatprep.mubr.msk.f32.mxu0 %vm3072_vm0, %v3799_v0  ;;  %2458 = vmatprep.mubr.msk.f32.mxu1 %vm3072_vm0, %v3799_v0  ;;  %v3138_v6 = vand.u32 4294901760, %v115_v3  ;;  %v112_v9 = vld [vmem:[#allocation8 + $0x50] sm:$0xff]  ;;  %v3140_v10 = vand.u32 4294901760, %v114_v7  ;;  %v3142_v11 = vand.u32 4294901760, %v113_v8  ;;  %v111_v13 = vld [vmem:[#allocation8 + $0x48] sm:$0xff]  ;;  %v110_v14 = vld [vmem:[#allocation8 + $0x40] sm:$0xff] }
  0x4f   :  { %v3144_v12 = vand.u32 4294901760, %v112_v9  ;;  %2392 = vmatpush3.msra.mxu0 %v3134_v4  ;;  %v3148_v15 = vsub.f32 %v117_v1, %v3134_v4  ;;  %v3151_v16 = vsub.f32 %v116_v2, %v3136_v5  ;;  %v3153_v17 = vand.u32 4294901760, %v111_v13  ;;  %v109_v19 = vld [vmem:[#allocation8 + $0x38] sm:$0xff]  ;;  %v108_v22 = vld [vmem:[#allocation8 + $0x30] sm:$0xff]  ;;  %v107_v23 = vld [vmem:[#allocation8 + $0x28] sm:$0xff]  ;;  %s2067_s5 = sshll.u32 %s3074_s4, 4  ;;  %s2068_s5 = int_to_ptr.vmem [resolvable:$true] %s2067_s5 }
  0x50   :  { %v3156_v18 = vsub.f32 %v115_v3, %v3138_v6  ;;  %2393 = vmatprep.subr.mxu0 %v3799_v0  ;;  %v3160_v20 = vsub.f32 %v114_v7, %v3140_v10  ;;  %v3163_v21 = vsub.f32 %v113_v8, %v3142_v11  ;;  %v3175_v27 = vand.u32 4294901760, %v110_v14  ;;  %v106_v28 = vld [vmem:[#allocation8 + $0x20] sm:$0xff]  ;;  %v105_v33 = vld [vmem:[#allocation8 + $0x18] sm:$0xff]  ;;  %v104_v34 = vld [vmem:[#allocation8 + $0x10] sm:$0xff]  ;;  %s3029_s29 = scalar_lea.vmem %s2068_s5, 64  ;;  %p3034_p3 = scmp.lt.s32.totalorder %s2068_s5, %s2068_s5 }
  0x51   :  { %2394 = vmatpush3.msra.mxu0 %v3136_v5  ;;  %v3167_v24 = vand.u32 4294901760, %v3148_v15  ;;  %v3170_v25 = vand.u32 4294901760, %v3151_v16  ;;  %v3181_v30 = vand.u32 4294901760, %v109_v19  ;;  %v3187_v32 = vsub.f32 %v112_v9, %v3144_v12  ;;  %v103_v47 = vld [vmem:[#allocation8 + $0x8] sm:$0xff]  ;;  %v3219_v48 = vld [vmem:[#allocation2] sm:$0xf]  ;;  %p3030_p2 = scmp.ne.s32.totalorder %s2068_s5, %s3029_s29  ;;  %p3035_p4 = scmp.lt.s32.totalorder %s3029_s29, %s3029_s29 }
  0x52   :  { %v3173_v26 = vand.u32 4294901760, %v3156_v18  ;;  %2395 = vmatprep.subr.mxu0 %v3799_v0  ;;  %v3179_v29 = vand.u32 4294901760, %v3160_v20  ;;  %v3184_v31 = vand.u32 4294901760, %v3163_v21  ;;  %v3197_v38 = vsub.f32 %v111_v13, %v3153_v17  ;;  %3810 = vst [vmem:[#allocation21_spill] sm:$0xff] %v3219_v48  ;;  %v102_v52 = vld [vmem:[#allocation8] sm:$0xff] }
  0x53   :  { %2396 = vmatpush3.msra.mxu0 %v3138_v6  ;;  %v214_v35 = vsub.f32 %v3148_v15, %v3167_v24  ;;  %v221_v36 = vsub.f32 %v3151_v16, %v3170_v25  ;;  %v3204_v41 = vand.u32 4294901760, %v108_v22  ;;  %v3207_v42 = vand.u32 4294901760, %v3187_v32  ;;  %p3036_p5 = por %p3035_p4, %p3034_p3 }
  0x54   :  { %v228_v37 = vsub.f32 %v3156_v18, %v3173_v26  ;;  %2397 = vmatprep.subr.mxu0 %v3799_v0  ;;  %v235_v39 = vsub.f32 %v3160_v20, %v3179_v29  ;;  %v242_v40 = vsub.f32 %v3163_v21, %v3184_v31  ;;  %v3214_v45 = vand.u32 4294901760, %v107_v23 }
  0x55   :  { %2398 = vmatpush3.msra.mxu0 %v3140_v10  ;;  %v3210_v43 = vand.u32 4294901760, %v214_v35  ;;  %v3212_v44 = vand.u32 4294901760, %v221_v36  ;;  %v3217_v46 = vand.u32 4294901760, %v3197_v38  ;;  %v249_v49 = vsub.f32 %v3187_v32, %v3207_v42  ;;  %p3037_p6 = pnand %p3036_p5, %p3030_p2 }
  0x56   :  { %2399 = vmatprep.subr.mxu0 %v3799_v0  ;;  %v3224_v50 = vand.u32 4294901760, %v106_v28  ;;  %v3227_v51 = vsub.f32 %v110_v14, %v3175_v27  ;;  %v3231_v53 = vand.u32 4294901760, %v228_v37  ;;  %v3233_v54 = vand.u32 4294901760, %v105_v33 }
  0x57   :  { %3808 = vst [vmem:[#allocation19_spill] sm:$0xff] %v3210_v43  ;;  %3809 = vst [vmem:[#allocation20_spill] sm:$0xff] %v3212_v44  ;;  %2400 = vmatpush3.msra.mxu0 %v3142_v11  ;;  %2427 = vmatpush3.msra.mxu1 %v3210_v43  ;;  %v3236_v55 = vsub.f32 %v109_v19, %v3181_v30  ;;  %v3238_v56 = vand.u32 4294901760, %v104_v34  ;;  %v3242_v57 = vand.u32 4294901760, %v235_v39  ;;  %v3244_v58 = vand.u32 4294901760, %v242_v40 }
  0x58   :  { %3811 = vst [vmem:[#allocation22_spill] sm:$0xff] %v3231_v53  ;;  %2401 = vmatprep.subr.mxu0 %v3799_v0  ;;  %2428 = vmatprep.subr.mxu1 %v3799_v0  ;;  %v3247_v59 = vand.u32 4294901760, %v3227_v51  ;;  %v3250_v60 = vsub.f32 %v108_v22, %v3204_v41  ;;  %v3254_v61 = vand.u32 4294901760, %v249_v49  ;;  %v256_v62 = vsub.f32 %v3197_v38, %v3217_v46 }
  0x59   :  { %3812 = vst [vmem:[#allocation23_spill] sm:$0xff] %v3242_v57  ;;  %3813 = vst [vmem:[#allocation24_spill] sm:$0xff] %v3244_v58  ;;  %2402 = vmatpush3.msra.mxu0 %v3144_v12  ;;  %2429 = vmatpush3.msra.mxu1 %v3212_v44  ;;  %v3259_v63 = vand.u32 4294901760, %v3236_v55  ;;  %v3262_v1 = vsub.f32 %v107_v23, %v3214_v45  ;;  %v3269_v3 = vand.u32 4294901760, %v103_v47  ;;  %v3275_v8 = vand.u32 4294901760, %v3219_v48 }
  0x5a   :  { %3814 = vst [vmem:[#allocation25_spill] sm:$0xff] %v3254_v61  ;;  %2403 = vmatprep.subr.mxu0 %v3799_v0  ;;  %2430 = vmatprep.subr.mxu1 %v3799_v0  ;;  %v3267_v2 = vand.u32 4294901760, %v3250_v60  ;;  %v3272_v7 = vsub.f32 %v106_v28, %v3224_v50  ;;  %v3282_v13 = vand.u32 4294901760, %v102_v52  ;;  %v3285_v14 = vsub.f32 %v105_v33, %v3233_v54 }
  0x5b   :  { %2404 = vmatpush3.msra.mxu0 %v3153_v17  ;;  %2431 = vmatpush3.msra.mxu1 %v3231_v53  ;;  %v3280_v9 = vand.u32 4294901760, %v3262_v1  ;;  %v3288_v19 = vsub.f32 %v104_v34, %v3238_v56  ;;  %v263_v22 = vsub.f32 %v3227_v51, %v3247_v59  ;;  %v270_v23 = vsub.f32 %v3236_v55, %v3259_v63 }
  0x5c   :  { %2405 = vmatprep.subr.mxu0 %v3799_v0  ;;  %2432 = vmatprep.subr.mxu1 %v3799_v0  ;;  %v3297_v28 = vand.u32 4294901760, %v3272_v7  ;;  %v3301_v33 = vsub.f32 %v3219_v48, %v3275_v8  ;;  %v277_v34 = vsub.f32 %v3250_v60, %v3267_v2  ;;  %v3310_v36 = vand.u32 4294901760, %v3285_v14 }
  0x5d   :  { %2406 = vmatpush3.msra.mxu0 %v3175_v27  ;;  %2433 = vmatpush3.msra.mxu1 %v3242_v57  ;;  %v284_v35 = vsub.f32 %v3262_v1, %v3280_v9  ;;  %v3313_v37 = vand.u32 4294901760, %v3288_v19  ;;  %v3321_v49 = vsub.f32 %v103_v47, %v3269_v3  ;;  %v3325_v48 = vand.u32 4294901760, %v256_v62 }
  0x5e   :  { %3815 = vst [vmem:[#allocation26_spill] sm:$0xff] %v3310_v36  ;;  %2407 = vmatprep.subr.mxu0 %v3799_v0  ;;  %2434 = vmatprep.subr.mxu1 %v3799_v0  ;;  %v291_v39 = vsub.f32 %v3272_v7, %v3297_v28  ;;  %v298_v57 = vsub.f32 %v3285_v14, %v3310_v36  ;;  %v3334_v40 = vand.u32 4294901760, %v263_v22  ;;  %v3817_v47 = vand.u32 4294901760, %v3301_v33 }
  0x5f   :  { %3816 = vst [vmem:[#allocation27_spill] sm:$0xff] %v3313_v37  ;;  %2408 = vmatpush3.msra.mxu0 %v3181_v30  ;;  %2435 = vmatpush3.msra.mxu1 %v3244_v58  ;;  %v3330_v53 = vsub.f32 %v102_v52, %v3282_v13  ;;  %v305_v62 = vsub.f32 %v3288_v19, %v3313_v37  ;;  %v3342_v58 = vand.u32 4294901760, %v3321_v49  ;;  %v3346_v52 = vand.u32 4294901760, %v270_v23 }
  0x60   :  { %2409 = vmatprep.subr.mxu0 %v3799_v0  ;;  %2436 = vmatprep.subr.mxu1 %v3799_v0  ;;  %v203_v44 = vsub.f32 %v3301_v33, %v3817_v47  ;;  %v3348_v43 = vand.u32 4294901760, %v277_v34  ;;  %v3350_v22 = vand.u32 4294901760, %v284_v35  ;;  %v3820_v47 = vmov 0.0  }
  0x61   :  { %3818 = vst [vmem:[#allocation28_spill] sm:$0xff] %v3342_v58  ;;  %2410 = vmatpush3.msra.mxu0 %v3204_v41  ;;  %2437 = vmatpush3.msra.mxu1 %v3254_v61  ;;  %v3353_v0 = vand.u32 4294901760, %v3330_v53  ;;  %v3357_v37 = vand.u32 4294901760, %v291_v39  ;;  %v3359_v36 = vand.u32 4294901760, %v298_v57  ;;  %v312_v61 = vsub.f32 %v3321_v49, %v3342_v58 }
  0x62   :  { %2411 = vmatprep.subr.mxu0 %v3820_v47  ;;  %2438 = vmatprep.subr.mxu1 %v3820_v47  ;;  %v204_v34 = vand.u32 4294901760, %v203_v44  ;;  %v3369_v35 = vand.u32 4294901760, %v305_v62  ;;  %v3821_v44 = vand.u32 4294901760, %v3301_v33  ;;  %v3824_v62 = vld [vmem:[#allocation19_spill] sm:$0xff] }
  0x63   :  { %3819 = vst [vmem:[#allocation29_spill] sm:$0xff] %v3353_v0  ;;  %2412 = vmatpush3.msra.mxu0 %v3214_v45  ;;  %2439 = vmatpush3.msra.mxu1 %v3325_v48  ;;  %v319_v23 = vsub.f32 %v3330_v53, %v3353_v0  ;;  %v3373_v57 = vand.u32 4294901760, %v312_v61 }
  0x64   :  { %2413 = vmatprep.subr.mxu0 %v3820_v47  ;;  %2440 = vmatprep.subr.mxu1 %v3820_v47 }
  0x65   :  { %2414 = vmatpush3.msra.mxu0 %v3224_v50  ;;  %2441 = vmatpush3.msra.mxu1 %v3334_v40  ;;  %v3375_v39 = vand.u32 4294901760, %v319_v23  ;;  %v3822_v61 = vld [vmem:[#allocation26_spill] sm:$0xff]  ;;  %v3825_v23 = vld [vmem:[#allocation20_spill] sm:$0xff] }
  0x66   :  { %2415 = vmatprep.subr.mxu0 %v3820_v47  ;;  %2442 = vmatprep.subr.mxu1 %v3820_v47 }
  0x67   :  { %2416 = vmatpush3.msra.mxu0 %v3233_v54  ;;  %2443 = vmatpush3.msra.mxu1 %v3346_v52 }
  0x68   :  { %2417 = vmatprep.subr.mxu0 %v3820_v47  ;;  %2444 = vmatprep.subr.mxu1 %v3820_v47 }
  0x69   :  { %2418 = vmatpush3.msra.mxu0 %v3238_v56  ;;  %2445 = vmatpush3.msra.mxu1 %v3348_v43 }
  0x6a   :  { %2419 = vmatprep.subr.mxu0 %v3820_v47  ;;  %2446 = vmatprep.subr.mxu1 %v3820_v47 }
  0x6b   :  { %2420 = vmatpush3.msra.mxu0 %v3269_v3  ;;  %2447 = vmatpush3.msra.mxu1 %v3350_v22 }
  0x6c   :  { %2421 = vmatprep.subr.mxu0 %v3820_v47  ;;  %2448 = vmatprep.subr.mxu1 %v3820_v47 }
  0x6d   :  { %2422 = vmatpush3.msra.mxu0 %v3282_v13  ;;  %2449 = vmatpush3.msra.mxu1 %v3357_v37 }
  0x6e   :  { %2450 = vmatprep.subr.mxu1 %v3820_v47  ;;  %2461 = vmatprep.subr.mxu0 %v3820_v47 }
  0x6f   :  { %2424 = vmatmul.mubr.f32.vlgmr.msra.gmra.mxu0 %v204_v34  ;;  %2451 = vmatpush3.msra.mxu1 %v3359_v36  ;;  %v3826_v34 = vld [vmem:[#allocation22_spill] sm:$0xff] }
  0x70   :  { %2462 = vmatpush3.msra.mxu0 %v3148_v15  ;;  %2452 = vmatprep.subr.mxu1 %v3820_v47 }
  0x71   :  { %2463 = vmatprep.subr.mxu0 %v3820_v47  ;;  %2453 = vmatpush3.msra.mxu1 %v3369_v35 }
  0x72   :  { %2464 = vmatpush3.msra.mxu0 %v3151_v16  ;;  %2454 = vmatprep.subr.mxu1 %v3820_v47 }
  0x73   :  { %2465 = vmatprep.subr.mxu0 %v3820_v47  ;;  %2455 = vmatpush3.msra.mxu1 %v3373_v57 }
  0x74   :  { %2466 = vmatpush3.msra.mxu0 %v3156_v18  ;;  %2456 = vmatprep.subr.mxu1 %v3820_v47 }
  0x75   :  { %2467 = vmatprep.subr.mxu0 %v3820_v47  ;;  %2457 = vmatpush3.msra.mxu1 %v3375_v39 }
  0x76   :  { %2468 = vmatpush3.msra.mxu0 %v3160_v20  ;;  %2459 = vmatmul.mubr.f32.vlgmr.msra.gmra.mxu1 %v3275_v8 }
  0x77   :  { %2469 = vmatprep.subr.mxu0 %v3820_v47  ;;  %2496 = vmatprep.subr.mxu1 %v3820_v47 }
  0x78   :  { %2470 = vmatpush3.msra.mxu0 %v3163_v21  ;;  %2497 = vmatpush3.msra.mxu1 %v3134_v4 }
  0x79   :  { %2471 = vmatprep.subr.mxu0 %v3820_v47  ;;  %2498 = vmatprep.subr.mxu1 %v3820_v47 }
  0x7a   :  { %2472 = vmatpush3.msra.mxu0 %v3187_v32  ;;  %2499 = vmatpush3.msra.mxu1 %v3136_v5 }
  0x7b   :  { %2473 = vmatprep.subr.mxu0 %v3820_v47  ;;  %2500 = vmatprep.subr.mxu1 %v3820_v47 }
  0x7c   :  { %2474 = vmatpush3.msra.mxu0 %v3197_v38  ;;  %2501 = vmatpush3.msra.mxu1 %v3138_v6 }
  0x7d   :  { %2475 = vmatprep.subr.mxu0 %v3820_v47  ;;  %2502 = vmatprep.subr.mxu1 %v3820_v47 }
  0x7e   :  { %2476 = vmatpush3.msra.mxu0 %v3227_v51  ;;  %2503 = vmatpush3.msra.mxu1 %v3140_v10 }
  0x7f   :  { %2477 = vmatprep.subr.mxu0 %v3820_v47  ;;  %2504 = vmatprep.subr.mxu1 %v3820_v47 }
  0x80   :  { %2478 = vmatpush3.msra.mxu0 %v3236_v55  ;;  %2505 = vmatpush3.msra.mxu1 %v3142_v11 }
  0x81   :  { %2479 = vmatprep.subr.mxu0 %v3820_v47  ;;  %2506 = vmatprep.subr.mxu1 %v3820_v47 }
  0x82   :  { %2480 = vmatpush3.msra.mxu0 %v3250_v60  ;;  %2507 = vmatpush3.msra.mxu1 %v3144_v12 }
  0x83   :  { %2481 = vmatprep.subr.mxu0 %v3820_v47  ;;  %2508 = vmatprep.subr.mxu1 %v3820_v47 }
  0x84   :  { %2482 = vmatpush3.msra.mxu0 %v3262_v1  ;;  %2509 = vmatpush3.msra.mxu1 %v3153_v17 }
  0x85   :  { %2483 = vmatprep.subr.mxu0 %v3820_v47  ;;  %2510 = vmatprep.subr.mxu1 %v3820_v47 }
  0x86   :  { %2484 = vmatpush3.msra.mxu0 %v3272_v7  ;;  %2511 = vmatpush3.msra.mxu1 %v3175_v27 }
  0x87   :  { %2485 = vmatprep.subr.mxu0 %v3820_v47  ;;  %2512 = vmatprep.subr.mxu1 %v3820_v47 }
  0x88   :  { %2486 = vmatpush3.msra.mxu0 %v3285_v14  ;;  %2513 = vmatpush3.msra.mxu1 %v3181_v30 }
  0x89   :  { %2487 = vmatprep.subr.mxu0 %v3820_v47  ;;  %2514 = vmatprep.subr.mxu1 %v3820_v47 }
  0x8a   :  { %2488 = vmatpush3.msra.mxu0 %v3288_v19  ;;  %2515 = vmatpush3.msra.mxu1 %v3204_v41 }
  0x8b   :  { %2489 = vmatprep.subr.mxu0 %v3820_v47  ;;  %2516 = vmatprep.subr.mxu1 %v3820_v47 }
  0x8c   :  { %2490 = vmatpush3.msra.mxu0 %v3321_v49  ;;  %2517 = vmatpush3.msra.mxu1 %v3214_v45 }
  0x8d   :  { %2491 = vmatprep.subr.mxu0 %v3820_v47  ;;  %2518 = vmatprep.subr.mxu1 %v3820_v47 }
  0x8e   :  { %2492 = vmatpush3.msra.mxu0 %v3330_v53  ;;  %2493 = vmatprep.mubr.msk.f32.mxu0 %vm3072_vm0, %v3820_v47 }
  0x8f   :  { %2519 = vmatpush3.msra.mxu1 %v3224_v50  ;;  %2494 = vmatmul.mubr.f32.vlgmr.msra.gmra.mxu0 %v3301_v33  ;;  %v3823_v33 = vld [vmem:[#allocation27_spill] sm:$0xff] }
  0x90   :  { %2520 = vmatprep.subr.mxu1 %v3820_v47  ;;  %2531 = vmatprep.subr.mxu0 %v3820_v47 }
  0x91   :  { %2521 = vmatpush3.msra.mxu1 %v3233_v54  ;;  %2532 = vmatpush3.msra.mxu0 %v3167_v24 }
  0x92   :  { %2522 = vmatprep.subr.mxu1 %v3820_v47  ;;  %2533 = vmatprep.subr.mxu0 %v3820_v47 }
  0x93   :  { %2523 = vmatpush3.msra.mxu1 %v3238_v56  ;;  %2534 = vmatpush3.msra.mxu0 %v3170_v25 }
  0x94   :  { %2524 = vmatprep.subr.mxu1 %v3820_v47  ;;  %2535 = vmatprep.subr.mxu0 %v3820_v47 }
  0x95   :  { %2525 = vmatpush3.msra.mxu1 %v3269_v3  ;;  %2536 = vmatpush3.msra.mxu0 %v3173_v26 }
  0x96   :  { %2526 = vmatprep.subr.mxu1 %v3820_v47  ;;  %2537 = vmatprep.subr.mxu0 %v3820_v47 }
  0x97   :  { %2527 = vmatpush3.msra.mxu1 %v3282_v13  ;;  %2528 = vmatprep.mubr.msk.f32.mxu1 %vm3072_vm0, %v3820_v47 }
  0x98   :  { %2538 = vmatpush3.msra.mxu0 %v3179_v29  ;;  %2529 = vmatmul.mubr.f32.vlgmr.msra.gmra.mxu1 %v3821_v44  ;;  %v3828_v44 = vld [vmem:[#allocation24_spill] sm:$0xff] }
  0x99   :  { %2539 = vmatprep.subr.mxu0 %v3820_v47  ;;  %2566 = vmatprep.subr.mxu1 %v3820_v47 }
  0x9a   :  { %2540 = vmatpush3.msra.mxu0 %v3184_v31  ;;  %2567 = vmatpush3.msra.mxu1 %v3134_v4 }
  0x9b   :  { %2541 = vmatprep.subr.mxu0 %v3820_v47  ;;  %2568 = vmatprep.subr.mxu1 %v3820_v47 }
  0x9c   :  { %2542 = vmatpush3.msra.mxu0 %v3207_v42  ;;  %2569 = vmatpush3.msra.mxu1 %v3136_v5 }
  0x9d   :  { %2543 = vmatprep.subr.mxu0 %v3820_v47  ;;  %2570 = vmatprep.subr.mxu1 %v3820_v47 }
  0x9e   :  { %2544 = vmatpush3.msra.mxu0 %v3217_v46  ;;  %2571 = vmatpush3.msra.mxu1 %v3138_v6 }
  0x9f   :  { %2545 = vmatprep.subr.mxu0 %v3820_v47  ;;  %2572 = vmatprep.subr.mxu1 %v3820_v47 }
  0xa0   :  { %2546 = vmatpush3.msra.mxu0 %v3247_v59  ;;  %2573 = vmatpush3.msra.mxu1 %v3140_v10 }
  0xa1   :  { %2547 = vmatprep.subr.mxu0 %v3820_v47  ;;  %2574 = vmatprep.subr.mxu1 %v3820_v47 }
  0xa2   :  { %2548 = vmatpush3.msra.mxu0 %v3259_v63  ;;  %2575 = vmatpush3.msra.mxu1 %v3142_v11 }
  0xa3   :  { %2549 = vmatprep.subr.mxu0 %v3820_v47  ;;  %2576 = vmatprep.subr.mxu1 %v3820_v47 }
  0xa4   :  { %2550 = vmatpush3.msra.mxu0 %v3267_v2  ;;  %2577 = vmatpush3.msra.mxu1 %v3144_v12 }
  0xa5   :  { %2551 = vmatprep.subr.mxu0 %v3820_v47  ;;  %2578 = vmatprep.subr.mxu1 %v3820_v47 }
  0xa6   :  { %2552 = vmatpush3.msra.mxu0 %v3280_v9  ;;  %2579 = vmatpush3.msra.mxu1 %v3153_v17 }
  0xa7   :  { %2553 = vmatprep.subr.mxu0 %v3820_v47  ;;  %2580 = vmatprep.subr.mxu1 %v3820_v47 }
  0xa8   :  { %2554 = vmatpush3.msra.mxu0 %v3297_v28  ;;  %2581 = vmatpush3.msra.mxu1 %v3175_v27 }
  0xa9   :  { %2555 = vmatprep.subr.mxu0 %v3820_v47  ;;  %2582 = vmatprep.subr.mxu1 %v3820_v47 }
  0xaa   :  { %2556 = vmatpush3.msra.mxu0 %v3822_v61  ;;  %2583 = vmatpush3.msra.mxu1 %v3181_v30 }
  0xab   :  { %2557 = vmatprep.subr.mxu0 %v3820_v47  ;;  %2584 = vmatprep.subr.mxu1 %v3820_v47 }
  0xac   :  { %2558 = vmatpush3.msra.mxu0 %v3823_v33  ;;  %2585 = vmatpush3.msra.mxu1 %v3204_v41 }
  0xad   :  { %2559 = vmatprep.subr.mxu0 %v3820_v47  ;;  %2586 = vmatprep.subr.mxu1 %v3820_v47 }
  0xae   :  { %2560 = vmatpush3.msra.mxu0 %v3342_v58  ;;  %2587 = vmatpush3.msra.mxu1 %v3214_v45 }
  0xaf   :  { %2561 = vmatprep.subr.mxu0 %v3820_v47  ;;  %2588 = vmatprep.subr.mxu1 %v3820_v47 }
  0xb0   :  { %2562 = vmatpush3.msra.mxu0 %v3353_v0  ;;  %2563 = vmatprep.mubr.msk.f32.mxu0 %vm3072_vm0, %v3820_v47 }
  0xb1   :  { %2589 = vmatpush3.msra.mxu1 %v3224_v50  ;;  %2564 = vmatmul.mubr.f32.vlgmr.msra.gmra.mxu0 %v3275_v8 }
  0xb2   :  { %2590 = vmatprep.subr.mxu1 %v3820_v47  ;;  %2598 = vmatprep.mubr.msk.f32.mxu1 %vm3072_vm0, %v3820_v47 }
  0xb3   :  { %2591 = vmatpush3.msra.mxu1 %v3233_v54  ;;  %2601 = vmatprep.subr.mxu0 %v3820_v47 }
  0xb4   :  { %2592 = vmatprep.subr.mxu1 %v3820_v47  ;;  %2602 = vmatpush3.msra.mxu0 %v3134_v4 }
  0xb5   :  { %2593 = vmatpush3.msra.mxu1 %v3238_v56  ;;  %2603 = vmatprep.subr.mxu0 %v3820_v47 }
  0xb6   :  { %2594 = vmatprep.subr.mxu1 %v3820_v47  ;;  %2604 = vmatpush3.msra.mxu0 %v3136_v5 }
  0xb7   :  { %2595 = vmatpush3.msra.mxu1 %v3269_v3  ;;  %2605 = vmatprep.subr.mxu0 %v3820_v47 }
  0xb8   :  { %2596 = vmatprep.subr.mxu1 %v3820_v47  ;;  %2606 = vmatpush3.msra.mxu0 %v3138_v6 }
  0xb9   :  { %2597 = vmatpush3.msra.mxu1 %v3282_v13  ;;  %2607 = vmatprep.subr.mxu0 %v3820_v47 }
  0xba   :  { %2599 = vmatmul.mubr.f32.vlgmr.msra.gmra.mxu1 %v3275_v8  ;;  %2636 = vmatprep.subr.mxu1 %v3820_v47  ;;  %v3827_v8 = vld [vmem:[#allocation23_spill] sm:$0xff] }
  0xbb   :  { %2637 = vmatpush3.msra.mxu1 %v3824_v62  ;;  %2608 = vmatpush3.msra.mxu0 %v3140_v10  ;;  %v3829_v62 = vld [vmem:[#allocation25_spill] sm:$0xff] }
  0xbc   :  { %2638 = vmatprep.subr.mxu1 %v3820_v47  ;;  %2609 = vmatprep.subr.mxu0 %v3820_v47 }
  0xbd   :  { %2639 = vmatpush3.msra.mxu1 %v3825_v23  ;;  %2610 = vmatpush3.msra.mxu0 %v3142_v11 }
  0xbe   :  { %2640 = vmatprep.subr.mxu1 %v3820_v47  ;;  %2611 = vmatprep.subr.mxu0 %v3820_v47 }
  0xbf   :  { %2641 = vmatpush3.msra.mxu1 %v3826_v34  ;;  %2612 = vmatpush3.msra.mxu0 %v3144_v12 }
  0xc0   :  { %2642 = vmatprep.subr.mxu1 %v3820_v47  ;;  %2613 = vmatprep.subr.mxu0 %v3820_v47 }
  0xc1   :  { %2643 = vmatpush3.msra.mxu1 %v3827_v8  ;;  %2614 = vmatpush3.msra.mxu0 %v3153_v17 }
  0xc2   :  { %2644 = vmatprep.subr.mxu1 %v3820_v47  ;;  %2615 = vmatprep.subr.mxu0 %v3820_v47 }
  0xc3   :  { %2645 = vmatpush3.msra.mxu1 %v3828_v44  ;;  %2616 = vmatpush3.msra.mxu0 %v3175_v27 }
  0xc4   :  { %2646 = vmatprep.subr.mxu1 %v3820_v47  ;;  %2617 = vmatprep.subr.mxu0 %v3820_v47 }
  0xc5   :  { %2647 = vmatpush3.msra.mxu1 %v3829_v62  ;;  %2618 = vmatpush3.msra.mxu0 %v3181_v30 }
  0xc6   :  { %2648 = vmatprep.subr.mxu1 %v3820_v47  ;;  %2619 = vmatprep.subr.mxu0 %v3820_v47 }
  0xc7   :  { %2649 = vmatpush3.msra.mxu1 %v3325_v48  ;;  %2620 = vmatpush3.msra.mxu0 %v3204_v41 }
  0xc8   :  { %2650 = vmatprep.subr.mxu1 %v3820_v47  ;;  %2621 = vmatprep.subr.mxu0 %v3820_v47 }
  0xc9   :  { %2651 = vmatpush3.msra.mxu1 %v3334_v40  ;;  %2622 = vmatpush3.msra.mxu0 %v3214_v45 }
  0xca   :  { %2652 = vmatprep.subr.mxu1 %v3820_v47  ;;  %2623 = vmatprep.subr.mxu0 %v3820_v47 }
  0xcb   :  { %2653 = vmatpush3.msra.mxu1 %v3346_v52  ;;  %2624 = vmatpush3.msra.mxu0 %v3224_v50 }
  0xcc   :  { %2654 = vmatprep.subr.mxu1 %v3820_v47  ;;  %2625 = vmatprep.subr.mxu0 %v3820_v47 }
  0xcd   :  { %2655 = vmatpush3.msra.mxu1 %v3348_v43  ;;  %2668 = vmatprep.mubr.msk.f32.mxu1 %vm3072_vm0, %v3820_v47 }
  0xce   :  { %2656 = vmatprep.subr.mxu1 %v3820_v47  ;;  %2626 = vmatpush3.msra.mxu0 %v3233_v54 }
  0xcf   :  { %2657 = vmatpush3.msra.mxu1 %v3350_v22  ;;  %2627 = vmatprep.subr.mxu0 %v3820_v47 }
  0xd0   :  { %2658 = vmatprep.subr.mxu1 %v3820_v47  ;;  %2628 = vmatpush3.msra.mxu0 %v3238_v56 }
  0xd1   :  { %2659 = vmatpush3.msra.mxu1 %v3357_v37  ;;  %2629 = vmatprep.subr.mxu0 %v3820_v47 }
  0xd2   :  { %2660 = vmatprep.subr.mxu1 %v3820_v47  ;;  %2630 = vmatpush3.msra.mxu0 %v3269_v3 }
  0xd3   :  { %2661 = vmatpush3.msra.mxu1 %v3359_v36  ;;  %2631 = vmatprep.subr.mxu0 %v3820_v47 }
  0xd4   :  { %2662 = vmatprep.subr.mxu1 %v3820_v47  ;;  %2632 = vmatpush3.msra.mxu0 %v3282_v13 }
  0xd5   :  { %2663 = vmatpush3.msra.mxu1 %v3369_v35  ;;  %2633 = vmatprep.mubr.msk.f32.mxu0 %vm3072_vm0, %v3820_v47 }
  0xd6   :  { %2664 = vmatprep.subr.mxu1 %v3820_v47  ;;  %2671 = vmatprep.subr.mxu0 %v3820_v47 }
  0xd7   :  { %2665 = vmatpush3.msra.mxu1 %v3373_v57 }
  0xd8   :  { %2666 = vmatprep.subr.mxu1 %v3820_v47 }
  0xd9   :  { %2667 = vmatpush3.msra.mxu1 %v3375_v39  ;;  %v3830_v39 = vld [vmem:[#allocation21_spill] sm:$0xff] }
  0xda   :  { %2706 = vmatprep.subr.mxu1 %v3820_v47 }
 0x12f   :  { %v206_v43 = vpop.f32.mrf.mxu0 }
 0x131   :  { %v2425_v48 = vpop.f32.mrf.mxu0 }
 0x136   :  { %v357_v36 = vpop.f32.mrf.mxu1 }
 0x137   :  { %v358_v34 = vadd.f32 %v357_v36, %v206_v43 }
 0x138   :  { %v2460_v37 = vpop.f32.mrf.mxu1 }
 0x14f   :  { %v461_v40 = vpop.f32.mrf.mxu0 }
 0x150   :  { %v462_v44 = vadd.f32 %v461_v40, %v358_v34 }
 0x151   :  { %v2495_v52 = vpop.f32.mrf.mxu0 }
 0x158   :  { %v550_v22 = vpop.f32.mrf.mxu1 }
 0x159   :  { %v551_v62 = vadd.f32 %v550_v22, %v462_v44 }
 0x15a   :  { %v2530_v35 = vpop.f32.mrf.mxu1 }
 0x171   :  { %v669_v23 = vpop.f32.mrf.mxu0 }
 0x172   :  { %v670_v57 = vadd.f32 %v669_v23, %v551_v62 }
 0x173   :  { %v2565_v8 = vpop.f32.mrf.mxu0 }
 0x17a   :  { %v756_v0 = vpop.f32.mrf.mxu1 }
 0x17b   :  { %v757_v58 = vadd.f32 %v756_v0, %v670_v57 }
 0x17c   :  { %v2600_v33 = vpop.f32.mrf.mxu1 }
 0x17d   :  { %v3614_v61 = vsub.f32 %v3830_v39, %v757_v58 }
 0x17f   :  { %v761_v48 = vmul.f32 %v3614_v61, %v3614_v61 }
 0x181   :  { %v3618_v37 = vand.u32 4294901760, %v761_v48 }
 0x183   :  { %v3621_v52 = vsub.f32 %v761_v48, %v3618_v37  ;;  %2669 = vmatmul.mubr.f32.vlgmr.msra.gmra.mxu1 %v3618_v37  ;;  %v1405_v48 = vlaneseq }
 0x184   :  { %2707 = vmatpush3.msra.mxu1 %v3134_v4  ;;  %2738 = vmatprep.mubr.msk.f32.mxu1 %vm3072_vm0, %v3820_v47 }
 0x185   :  { %2708 = vmatprep.subr.mxu1 %v3820_v47  ;;  %v845_v0 = vand.u32 4294901760, %v3621_v52 }
 0x186   :  { %2709 = vmatpush3.msra.mxu1 %v3136_v5 }
 0x187   :  { %2710 = vmatprep.subr.mxu1 %v3820_v47  ;;  %v846_v58 = vsub.f32 %v3621_v52, %v845_v0 }
 0x188   :  { %2711 = vmatpush3.msra.mxu1 %v3138_v6 }
 0x189   :  { %2712 = vmatprep.subr.mxu1 %v3820_v47  ;;  %v847_v33 = vand.u32 4294901760, %v846_v58 }
 0x18a   :  { %2713 = vmatpush3.msra.mxu1 %v3140_v10 }
 0x18b   :  { %2714 = vmatprep.subr.mxu1 %v3820_v47  ;;  %2634 = vmatmul.mubr.f32.vlgmr.msra.gmra.mxu0 %v847_v33 }
 0x18c   :  { %2672 = vmatpush3.msra.mxu0 %v3148_v15  ;;  %2715 = vmatpush3.msra.mxu1 %v3142_v11  ;;  %v2827_v15 = vld [vmem:[#allocation10 + $0xe0] ss:$16 sps:$4 sm:$0xff]  }
 0x18d   :  { %2673 = vmatprep.subr.mxu0 %v3820_v47  ;;  %2716 = vmatprep.subr.mxu1 %v3820_v47 }
 0x18e   :  { %2674 = vmatpush3.msra.mxu0 %v3151_v16  ;;  %2717 = vmatpush3.msra.mxu1 %v3144_v12  ;;  %v2830_v16 = vld [vmem:[#allocation10 + $0xe8] ss:$16 sps:$4 sm:$0xff]  }
 0x18f   :  { %2675 = vmatprep.subr.mxu0 %v3820_v47  ;;  %2718 = vmatprep.subr.mxu1 %v3820_v47 }
 0x190   :  { %2676 = vmatpush3.msra.mxu0 %v3156_v18  ;;  %2719 = vmatpush3.msra.mxu1 %v3153_v17  ;;  %v2838_v18 = vld [vmem:[#allocation10 + $0xcc] ss:$16 sps:$4 sm:$0xff]  }
 0x191   :  { %2677 = vmatprep.subr.mxu0 %v3820_v47  ;;  %2720 = vmatprep.subr.mxu1 %v3820_v47 }
 0x192   :  { %2678 = vmatpush3.msra.mxu0 %v3160_v20  ;;  %2721 = vmatpush3.msra.mxu1 %v3175_v27  ;;  %v2833_v20 = vld [vmem:[#allocation10 + $0xc0] ss:$16 sps:$4 sm:$0xff]  }
 0x193   :  { %2679 = vmatprep.subr.mxu0 %v3820_v47  ;;  %2722 = vmatprep.subr.mxu1 %v3820_v47 }
 0x194   :  { %2680 = vmatpush3.msra.mxu0 %v3163_v21  ;;  %2723 = vmatpush3.msra.mxu1 %v3181_v30  ;;  %v2836_v21 = vld [vmem:[#allocation10 + $0xc8] ss:$16 sps:$4 sm:$0xff]  }
 0x195   :  { %2681 = vmatprep.subr.mxu0 %v3820_v47  ;;  %2724 = vmatprep.subr.mxu1 %v3820_v47 }
 0x196   :  { %2682 = vmatpush3.msra.mxu0 %v3187_v32  ;;  %2725 = vmatpush3.msra.mxu1 %v3204_v41  ;;  %v2850_v32 = vld [vmem:[#allocation10 + $0x8c] ss:$16 sps:$4 sm:$0xff]  }
 0x197   :  { %2683 = vmatprep.subr.mxu0 %v3820_v47  ;;  %2726 = vmatprep.subr.mxu1 %v3820_v47 }
 0x198   :  { %2684 = vmatpush3.msra.mxu0 %v3197_v38  ;;  %2727 = vmatpush3.msra.mxu1 %v3214_v45  ;;  %v2853_v38 = vld [vmem:[#allocation10 + $0x64] ss:$16 sps:$4 sm:$0xff]  }
 0x199   :  { %2685 = vmatprep.subr.mxu0 %v3820_v47  ;;  %2728 = vmatprep.subr.mxu1 %v3820_v47 }
 0x19a   :  { %2686 = vmatpush3.msra.mxu0 %v3227_v51  ;;  %2729 = vmatpush3.msra.mxu1 %v3224_v50  ;;  %v2857_v51 = vld [vmem:[#allocation10 + $0x40] ss:$16 sps:$4 sm:$0xff]  }
 0x19b   :  { %2687 = vmatprep.subr.mxu0 %v3820_v47  ;;  %2730 = vmatprep.subr.mxu1 %v3820_v47 }
 0x19c   :  { %2688 = vmatpush3.msra.mxu0 %v3236_v55  ;;  %2731 = vmatpush3.msra.mxu1 %v3233_v54  ;;  %v2865_v55 = vld [vmem:[#allocation10 + $0x24] ss:$16 sps:$4 sm:$0xff]  }
 0x19d   :  { %2689 = vmatprep.subr.mxu0 %v3820_v47  ;;  %2732 = vmatprep.subr.mxu1 %v3820_v47 }
 0x19e   :  { %2690 = vmatpush3.msra.mxu0 %v3250_v60  ;;  %2733 = vmatpush3.msra.mxu1 %v3238_v56  ;;  %v2866_v60 = vld [vmem:[#allocation10 + $0x28] ss:$16 sps:$4 sm:$0xff]  }
 0x19f   :  { %2691 = vmatprep.subr.mxu0 %v3820_v47  ;;  %2734 = vmatprep.subr.mxu1 %v3820_v47 }
 0x1a0   :  { %2692 = vmatpush3.msra.mxu0 %v3262_v1  ;;  %2735 = vmatpush3.msra.mxu1 %v3269_v3  ;;  %v2874_v1 = vld [vmem:[#allocation10 + $0xc] ss:$16 sps:$4 sm:$0xff]  }
 0x1a1   :  { %2693 = vmatprep.subr.mxu0 %v3820_v47  ;;  %2736 = vmatprep.subr.mxu1 %v3820_v47 }
 0x1a2   :  { %2694 = vmatpush3.msra.mxu0 %v3272_v7  ;;  %2737 = vmatpush3.msra.mxu1 %v3282_v13  ;;  %v2875_v7 = vld [vmem:[#allocation11 + $0x78] sm:$0xff]  }
 0x1a3   :  { %2695 = vmatprep.subr.mxu0 %v3820_v47  ;;  %2739 = vmatmul.mubr.f32.vlgmr.msra.gmra.mxu1 %v845_v0  ;;  %v3766_v0 = vld [vmem:[#allocation5] sm:$0x7] }
 0x1a4   :  { %2776 = vmatprep.subr.mxu1 %v3820_v47  ;;  %2696 = vmatpush3.msra.mxu0 %v3285_v14 }
 0x1a5   :  { %2777 = vmatpush3.msra.mxu1 %v3134_v4  ;;  %2697 = vmatprep.subr.mxu0 %v3820_v47  ;;  %v3831_v4 = vld [vmem:[#allocation26_spill] sm:$0xff] }
 0x1a6   :  { %2778 = vmatprep.subr.mxu1 %v3820_v47  ;;  %2698 = vmatpush3.msra.mxu0 %v3288_v19 }
 0x1a7   :  { %2779 = vmatpush3.msra.mxu1 %v3136_v5  ;;  %2699 = vmatprep.subr.mxu0 %v3820_v47  ;;  %v3832_v5 = vld [vmem:[#allocation27_spill] sm:$0xff] }
 0x1a8   :  { %2780 = vmatprep.subr.mxu1 %v3820_v47  ;;  %2700 = vmatpush3.msra.mxu0 %v3321_v49 }
 0x1a9   :  { %2781 = vmatpush3.msra.mxu1 %v3138_v6  ;;  %2701 = vmatprep.subr.mxu0 %v3820_v47  ;;  %v3833_v6 = vld [vmem:[#allocation28_spill] sm:$0xff] }
 0x1aa   :  { %2782 = vmatprep.subr.mxu1 %v3820_v47  ;;  %2702 = vmatpush3.msra.mxu0 %v3330_v53  ;;  %v3073_v53 = vmov 0  }
 0x1ab   :  { %2703 = vmatprep.mubr.msk.f32.mxu0 %vm3072_vm0, %v3820_v47  ;;  %2783 = vmatpush3.msra.mxu1 %v3140_v10  ;;  %v3834_v10 = vld [vmem:[#allocation29_spill] sm:$0xff] }
 0x1ac   :  { %2704 = vmatmul.mubr.f32.vlgmr.msra.gmra.mxu0 %v3621_v52  ;;  %2741 = vmatprep.subr.mxu0 %v3820_v47 }
 0x1ad   :  { %2784 = vmatprep.subr.mxu1 %v3820_v47  ;;  %2742 = vmatpush3.msra.mxu0 %v3167_v24  ;;  %v2841_v24 = vld [vmem:[#allocation10 + $0xa4] ss:$16 sps:$4 sm:$0xff]  }
 0x1ae   :  { %2785 = vmatpush3.msra.mxu1 %v3142_v11  ;;  %2743 = vmatprep.subr.mxu0 %v3820_v47  ;;  %v2829_v11 = vld [vmem:[#allocation10 + $0xe4] ss:$16 sps:$4 sm:$0xff]  }
 0x1af   :  { %2786 = vmatprep.subr.mxu1 %v3820_v47  ;;  %2744 = vmatpush3.msra.mxu0 %v3170_v25  ;;  %v2844_v25 = vld [vmem:[#allocation10 + $0xac] ss:$16 sps:$4 sm:$0xff]  }
 0x1b0   :  { %2787 = vmatpush3.msra.mxu1 %v3144_v12  ;;  %2745 = vmatprep.subr.mxu0 %v3820_v47  ;;  %v2832_v12 = vld [vmem:[#allocation10 + $0xec] ss:$16 sps:$4 sm:$0xff]  }
 0x1b1   :  { %2788 = vmatprep.subr.mxu1 %v3820_v47  ;;  %2746 = vmatpush3.msra.mxu0 %v3173_v26  ;;  %v2839_v26 = vld [vmem:[#allocation10 + $0xa0] ss:$16 sps:$4 sm:$0xff]  }
 0x1b2   :  { %2789 = vmatpush3.msra.mxu1 %v3153_v17  ;;  %2747 = vmatprep.subr.mxu0 %v3820_v47  ;;  %v2835_v17 = vld [vmem:[#allocation10 + $0xc4] ss:$16 sps:$4 sm:$0xff]  }
 0x1b3   :  { %2790 = vmatprep.subr.mxu1 %v3820_v47  ;;  %2748 = vmatpush3.msra.mxu0 %v3179_v29  ;;  %v2845_v29 = vld [vmem:[#allocation10 + $0x80] ss:$16 sps:$4 sm:$0xff]  }
 0x1b4   :  { %2791 = vmatpush3.msra.mxu1 %v3175_v27  ;;  %2749 = vmatprep.subr.mxu0 %v3820_v47  ;;  %v2842_v27 = vld [vmem:[#allocation10 + $0xa8] ss:$16 sps:$4 sm:$0xff]  }
 0x1b5   :  { %2792 = vmatprep.subr.mxu1 %v3820_v47  ;;  %2750 = vmatpush3.msra.mxu0 %v3184_v31  ;;  %v2848_v31 = vld [vmem:[#allocation10 + $0x88] ss:$16 sps:$4 sm:$0xff]  }
 0x1b6   :  { %2793 = vmatpush3.msra.mxu1 %v3181_v30  ;;  %2751 = vmatprep.subr.mxu0 %v3820_v47  ;;  %v2847_v30 = vld [vmem:[#allocation10 + $0x84] ss:$16 sps:$4 sm:$0xff]  }
 0x1b7   :  { %2794 = vmatprep.subr.mxu1 %v3820_v47  ;;  %2752 = vmatpush3.msra.mxu0 %v3207_v42  ;;  %v2851_v42 = vld [vmem:[#allocation10 + $0x60] ss:$16 sps:$4 sm:$0xff]  }
 0x1b8   :  { %2795 = vmatpush3.msra.mxu1 %v3204_v41  ;;  %2753 = vmatprep.subr.mxu0 %v3820_v47  ;;  %v2856_v41 = vld [vmem:[#allocation10 + $0x6c] ss:$16 sps:$4 sm:$0xff]  }
 0x1b9   :  { %2796 = vmatprep.subr.mxu1 %v3820_v47  ;;  %2754 = vmatpush3.msra.mxu0 %v3217_v46  ;;  %v2859_v46 = vld [vmem:[#allocation10 + $0x44] ss:$16 sps:$4 sm:$0xff]  }
 0x1ba   :  { %2797 = vmatpush3.msra.mxu1 %v3214_v45  ;;  %2755 = vmatprep.subr.mxu0 %v3820_v47  ;;  %v2854_v45 = vld [vmem:[#allocation10 + $0x68] ss:$16 sps:$4 sm:$0xff]  }
 0x1bb   :  { %2798 = vmatprep.subr.mxu1 %v3820_v47  ;;  %2756 = vmatpush3.msra.mxu0 %v3247_v59  ;;  %v2863_v59 = vld [vmem:[#allocation10 + $0x20] ss:$16 sps:$4 sm:$0xff]  }
 0x1bc   :  { %2799 = vmatpush3.msra.mxu1 %v3224_v50  ;;  %2757 = vmatprep.subr.mxu0 %v3820_v47  ;;  %v2862_v50 = vld [vmem:[#allocation10 + $0x4c] ss:$16 sps:$4 sm:$0xff]  }
 0x1bd   :  { %2800 = vmatprep.subr.mxu1 %v3820_v47  ;;  %2758 = vmatpush3.msra.mxu0 %v3259_v63  ;;  %v2871_v63 = vld [vmem:[#allocation10 + $0x4] ss:$16 sps:$4 sm:$0xff]  }
 0x1be   :  { %2801 = vmatpush3.msra.mxu1 %v3233_v54  ;;  %2759 = vmatprep.subr.mxu0 %v3820_v47  ;;  %v2860_v54 = vld [vmem:[#allocation10 + $0x48] ss:$16 sps:$4 sm:$0xff]  }
 0x1bf   :  { %2802 = vmatprep.subr.mxu1 %v3820_v47  ;;  %2760 = vmatpush3.msra.mxu0 %v3267_v2  ;;  %v2869_v2 = vld [vmem:[#allocation10] ss:$16 sps:$4 sm:$0xff]  }
 0x1c0   :  { %2803 = vmatpush3.msra.mxu1 %v3238_v56  ;;  %2761 = vmatprep.subr.mxu0 %v3820_v47  ;;  %v2868_v56 = vld [vmem:[#allocation10 + $0x2c] ss:$16 sps:$4 sm:$0xff]  }
 0x1c1   :  { %2804 = vmatprep.subr.mxu1 %v3820_v47  ;;  %2762 = vmatpush3.msra.mxu0 %v3280_v9  ;;  %v2876_v9 = vld [vmem:[#allocation11 + $0xf8] sm:$0xff]  }
 0x1c2   :  { %2805 = vmatpush3.msra.mxu1 %v3269_v3  ;;  %2763 = vmatprep.subr.mxu0 %v3820_v47  ;;  %v2872_v3 = vld [vmem:[#allocation10 + $0x8] ss:$16 sps:$4 sm:$0xff]  }
 0x1c3   :  { %2806 = vmatprep.subr.mxu1 %v3820_v47  ;;  %2764 = vmatpush3.msra.mxu0 %v3297_v28 }
 0x1c4   :  { %2807 = vmatpush3.msra.mxu1 %v3282_v13  ;;  %2808 = vmatprep.mubr.msk.f32.mxu1 %vm3072_vm0, %v3820_v47 }
 0x1c5   :  { %2765 = vmatprep.subr.mxu0 %v3820_v47  ;;  %2809 = vmatmul.mubr.f32.vlgmr.msra.gmra.mxu1 %v3618_v37 }
 0x1c6   :  { %2766 = vmatpush3.msra.mxu0 %v3831_v4  ;;  %2773 = vmatprep.mubr.msk.f32.mxu0 %vm3072_vm0, %v3820_v47 }
 0x1c7   :  { %2767 = vmatprep.subr.mxu0 %v3820_v47  ;;  %1671 = vmatprep.subr.bf16.mxu1 %v2832_v12  ;;  %v2877_v12 = vld [vmem:[#allocation11 + $0x38] sm:$0xff]  }
 0x1c8   :  { %2768 = vmatpush3.msra.mxu0 %v3832_v5  ;;  %1672 = vmatpush1.bf16.msra.mxu1 %v2830_v16 }
 0x1c9   :  { %2769 = vmatprep.subr.mxu0 %v3820_v47  ;;  %1673 = vmatprep.subr.bf16.mxu1 %v2838_v18  ;;  %v2880_v18 = vld [vmem:[#allocation11 + $0xf0] sm:$0xff]  }
 0x1ca   :  { %2770 = vmatpush3.msra.mxu0 %v3833_v6  ;;  %1703 = vmatprep.mubr.bf16.mxu1 %v3073_v53 }
 0x1cb   :  { %2771 = vmatprep.subr.mxu0 %v3820_v47 }
 0x1cc   :  { %2772 = vmatpush3.msra.mxu0 %v3834_v10  ;;  %1674 = vmatpush1.bf16.msra.mxu1 %v2836_v21  ;;  %v2882_v21 = vld [vmem:[#allocation11 + $0xb0] sm:$0xff]  }
 0x1cd   :  { %2774 = vmatmul.mubr.f32.vlgmr.msra.gmra.mxu0 %v3618_v37  ;;  %1630 = vmatprep.subr.bf16.mxu0 %v2829_v11  ;;  %v3763_v37 = vshrl.u32 %v1405_v48, 7 }
 0x1ce   :  { %1631 = vmatpush1.bf16.msra.mxu0 %v2827_v15  ;;  %1675 = vmatprep.subr.bf16.mxu1 %v2844_v25  ;;  %v2878_v15 = vld [vmem:[#allocation11 + $0xb8] sm:$0xff]   ;;  %v2885_v25 = vld [vmem:[#allocation11 + $0x28] sm:$0xff]  }
 0x1cf   :  { %1632 = vmatprep.subr.bf16.mxu0 %v2835_v17  ;;  %1662 = vmatprep.mubr.bf16.mxu0 %v3073_v53  ;;  %v1407_v52 = vsub.s32 0, %v3763_v37  ;;  %v1412_v58 = vsub.s32 1, %v3763_v37  ;;  %v2879_v17 = vld [vmem:[#allocation11 + $0x70] sm:$0xff]   ;;  %v2899_v53 = vld [vmem:[#allocation11 + $0x48] sm:$0xff]  }
 0x1d0   :  { %1676 = vmatpush1.bf16.msra.mxu1 %v2842_v27  ;;  %v2887_v27 = vld [vmem:[#allocation11 + $0x60] sm:$0xff]  }
 0x1d1   :  { %1677 = vmatprep.subr.bf16.mxu1 %v2850_v32  ;;  %v1408_v33 = vrot.slane %v3766_v0, %v1407_v52  ;;  %v1413_v6 = vrot.slane %v3766_v0, %v1412_v58  ;;  %v2891_v32 = vld [vmem:[#allocation11 + $0x58] sm:$0xff]  }
 0x1d2   :  { %1633 = vmatpush1.bf16.msra.mxu0 %v2833_v20  ;;  %v2881_v20 = vld [vmem:[#allocation11 + $0x30] sm:$0xff]  }
 0x1d3   :  { %1634 = vmatprep.subr.bf16.mxu0 %v2841_v24  ;;  %v2884_v24 = vld [vmem:[#allocation11 + $0xe8] sm:$0xff]  }
 0x1d4   :  { %1678 = vmatpush1.bf16.msra.mxu1 %v2848_v31  ;;  %v2890_v31 = vld [vmem:[#allocation11 + $0xa0] sm:$0xff]  }
 0x1d5   :  { %1679 = vmatprep.subr.bf16.mxu1 %v2856_v41  ;;  %v2893_v41 = vld [vmem:[#allocation11 + $0x18] sm:$0xff]  }
 0x1d6   :  { %1635 = vmatpush1.bf16.msra.mxu0 %v2839_v26  ;;  %v2886_v26 = vld [vmem:[#allocation11 + $0xa8] sm:$0xff]  }
 0x1d7   :  { %1636 = vmatprep.subr.bf16.mxu0 %v2847_v30  ;;  %v2889_v30 = vld [vmem:[#allocation11 + $0x20] sm:$0xff]  }
 0x1d8   :  { %1680 = vmatpush1.bf16.msra.mxu1 %v2854_v45  ;;  %v2895_v45 = vld [vmem:[#allocation11 + $0x50] sm:$0xff]  }
 0x1d9   :  { %1681 = vmatprep.subr.bf16.mxu1 %v2862_v50  ;;  %v2897_v50 = vld [vmem:[#allocation11 + $0x10] sm:$0xff]  }
 0x1da   :  { %1637 = vmatpush1.bf16.msra.mxu0 %v2845_v29  ;;  %v2888_v29 = vld [vmem:[#allocation11 + $0xe0] sm:$0xff]  }
 0x1db   :  { %1638 = vmatprep.subr.bf16.mxu0 %v2853_v38  ;;  %v2892_v38 = vld [vmem:[#allocation11 + $0xd8] sm:$0xff]  }
 0x1dc   :  { %1682 = vmatpush1.bf16.msra.mxu1 %v2860_v54  ;;  %v2900_v54 = vld [vmem:[#allocation11 + $0xc8] sm:$0xff]  }
 0x1dd   :  { %1683 = vmatprep.subr.bf16.mxu1 %v2868_v56  ;;  %v2902_v56 = vld [vmem:[#allocation11 + $0x88] sm:$0xff]  }
 0x1de   :  { %1639 = vmatpush1.bf16.msra.mxu0 %v2851_v42  ;;  %v2894_v42 = vld [vmem:[#allocation11 + $0x98] sm:$0xff]  }
 0x1df   :  { %1640 = vmatprep.subr.bf16.mxu0 %v2859_v46  ;;  %v2896_v46 = vld [vmem:[#allocation11 + $0xd0] sm:$0xff]  }
 0x1e0   :  { %1684 = vmatpush1.bf16.msra.mxu1 %v2866_v60  ;;  %v2904_v60 = vld [vmem:[#allocation11 + $0xc0] sm:$0xff]  }
 0x1e1   :  { %1685 = vmatprep.subr.bf16.mxu1 %v2874_v1  ;;  %v2906_v1 = vld [vmem:[#allocation11 + $0x80] sm:$0xff]  }
 0x1e2   :  { %1641 = vmatpush1.bf16.msra.mxu0 %v2857_v51  ;;  %v2898_v51 = vld [vmem:[#allocation11 + $0x90] sm:$0xff]  }
 0x1e3   :  { %1642 = vmatprep.subr.bf16.mxu0 %v2865_v55  ;;  %v2901_v55 = vld [vmem:[#allocation11 + $0x8] sm:$0xff]  }
 0x1e4   :  { %1686 = vmatpush1.bf16.msra.mxu1 %v2872_v3  ;;  %v1448_v3 = vld [vmem:[#allocation7] sm:$0xf] }
 0x1e5   :  { %2369 = vmatprep.subr.bf16.mxu1 %v2876_v9  ;;  %v1453_v9 = vrot.slane %v1448_v3, %v1407_v52 }
 0x1e6   :  { %1643 = vmatpush1.bf16.msra.mxu0 %v2863_v59  ;;  %v2903_v59 = vld [vmem:[#allocation11 + $0x40] sm:$0xff]  }
 0x1e7   :  { %1644 = vmatprep.subr.bf16.mxu0 %v2871_v63  ;;  %v2905_v63 = vld [vmem:[#allocation11] sm:$0xff]  }
 0x1ea   :  { %1645 = vmatpush1.bf16.msra.mxu0 %v2869_v2  ;;  %v1460_v2 = vsub.s32 2, %v3763_v37 }
 0x1eb   :  { %2347 = vmatprep.subr.bf16.mxu0 %v2875_v7  ;;  %v1464_v7 = vsub.s32 3, %v3763_v37 }
 0x243   :  { %v1000_v13 = vpop.f32.mrf.mxu1 }
 0x245   :  { %v2670_v14 = vpop.f32.mrf.mxu1 }
 0x246   :  { %v1457_v14 = vrot.slane %v1448_v3, %v1412_v58 }
 0x24b   :  { %v849_v19 = vpop.f32.mrf.mxu0 }
 0x24c   :  { %v850_v40 = vadd.f32 1e-05, %v849_v19  ;;  %v1465_v19 = vrot.slane %v1448_v3, %v1464_v7 }
 0x24d   :  { %v2635_v28 = vpop.f32.mrf.mxu0 }
 0x24e   :  { %v1001_v35 = vadd.f32 %v1000_v13, %v850_v40  ;;  %v1461_v13 = vrot.slane %v1448_v3, %v1460_v2 }
 0x263   :  { %v1193_v49 = vpop.f32.mrf.mxu1 }
 0x265   :  { %v2740_v47 = vpop.f32.mrf.mxu1 }
 0x26c   :  { %v1104_v43 = vpop.f32.mrf.mxu0 }
 0x26d   :  { %v1105_v34 = vadd.f32 %v1104_v43, %v1001_v35 }
 0x26e   :  { %v2705_v36 = vpop.f32.mrf.mxu0 }
 0x26f   :  { %v1194_v8 = vadd.f32 %v1193_v49, %v1105_v34 }
 0x285   :  { %v1399_v22 = vpop.f32.mrf.mxu1 }
 0x287   :  { %v2810_v23 = vpop.f32.mrf.mxu1 }
 0x28d   :  { %v1312_v44 = vpop.f32.mrf.mxu0 }
 0x28e   :  { %v1313_v62 = vadd.f32 %v1312_v44, %v1194_v8 }
 0x28f   :  { %v2775_v57 = vpop.f32.mrf.mxu0 }
 0x290   :  { %v1400_v39 = vadd.f32 %v1399_v22, %v1313_v62 }
 0x292   :  { %2907 = vrsqrt.f32 %v1400_v39 }
 0x29f   :  { %v2908_v4 = vpop.eup %2907 }
 0x2a0   :  { %v1404_v5 = vmul.f32 %v2908_v4, %v3614_v61  ;;  %v2883_v61 = vld [vmem:[#allocation11 + $0x68] sm:$0xff]  }
 0x2a2   :  { %v1409_v10 = vmul.f32 %v1408_v33, %v1404_v5 }
 0x2a4   :  { %v1414_v11 = vadd.f32 %v1413_v6, %v1409_v10  ;;  %v1787_v6 = vrot.slane %v3766_v0, %v1460_v2 }
 0x2a6   :  { %v1415_v16 = vpack.c.bf16 %v1414_v11, %v1414_v11 }
 0x2a8   :  { %1663 = vmatmul.mubr.bf16.vlgmr.msra.gmra.mxu0 %v1415_v16  ;;  %1704 = vmatmul.mubr.bf16.vlgmr.msra.gmra.mxu1 %v1415_v16 }
 0x2a9   :  { %2348 = vmatpush3.bf16.msra.mxu0 %v2877_v12  ;;  %2370 = vmatpush3.bf16.msra.mxu1 %v2878_v15 }
 0x2aa   :  { %2349 = vmatprep.subr.bf16.mxu0 %v2879_v17  ;;  %2371 = vmatprep.subr.bf16.mxu1 %v2880_v18 }
 0x2ad   :  { %2350 = vmatpush3.bf16.msra.mxu0 %v2881_v20  ;;  %2372 = vmatpush3.bf16.msra.mxu1 %v2882_v21 }
 0x2ae   :  { %2351 = vmatprep.subr.bf16.mxu0 %v2883_v61  ;;  %2373 = vmatprep.subr.bf16.mxu1 %v2884_v24 }
 0x2b1   :  { %2352 = vmatpush3.bf16.msra.mxu0 %v2885_v25  ;;  %2374 = vmatpush3.bf16.msra.mxu1 %v2886_v26 }
 0x2b2   :  { %2353 = vmatprep.subr.bf16.mxu0 %v2887_v27  ;;  %2375 = vmatprep.subr.bf16.mxu1 %v2888_v29 }
 0x2b5   :  { %2354 = vmatpush3.bf16.msra.mxu0 %v2889_v30  ;;  %2376 = vmatpush3.bf16.msra.mxu1 %v2890_v31 }
 0x2b6   :  { %2355 = vmatprep.subr.bf16.mxu0 %v2891_v32  ;;  %2377 = vmatprep.subr.bf16.mxu1 %v2892_v38 }
 0x2b9   :  { %2356 = vmatpush3.bf16.msra.mxu0 %v2893_v41  ;;  %2378 = vmatpush3.bf16.msra.mxu1 %v2894_v42 }
 0x2ba   :  { %2357 = vmatprep.subr.bf16.mxu0 %v2895_v45  ;;  %2379 = vmatprep.subr.bf16.mxu1 %v2896_v46 }
 0x2bd   :  { %2358 = vmatpush3.bf16.msra.mxu0 %v2897_v50  ;;  %2380 = vmatpush3.bf16.msra.mxu1 %v2898_v51 }
 0x2be   :  { %2359 = vmatprep.subr.bf16.mxu0 %v2899_v53  ;;  %2381 = vmatprep.subr.bf16.mxu1 %v2900_v54 }
 0x2c1   :  { %2360 = vmatpush3.bf16.msra.mxu0 %v2901_v55  ;;  %2382 = vmatpush3.bf16.msra.mxu1 %v2902_v56 }
 0x2c2   :  { %2361 = vmatprep.subr.bf16.mxu0 %v2903_v59  ;;  %2383 = vmatprep.subr.bf16.mxu1 %v2904_v60 }
 0x2c5   :  { %2362 = vmatpush3.bf16.msra.mxu0 %v2905_v63  ;;  %2384 = vmatpush3.bf16.msra.mxu1 %v2906_v1 }
 0x368   :  { %v1664_v28 = vpop.f32.mrf.mxu0  ;;  %v1705_v49 = vpop.f32.mrf.mxu1 }
 0x369   :  { %v1665_v47 = vadd.f32 %v1664_v28, %v1453_v9  ;;  %v1706_v43 = vadd.f32 %v1705_v49, %v1461_v13 }
 0x36a   :  { %v1666_v36 = vpop.f32.mrf.mxu0  ;;  %v1707_v40 = vpop.f32.mrf.mxu1 }
 0x36b   :  { %v1667_v22 = vadd.f32 %v1666_v36, %v1457_v14  ;;  %v1708_v35 = vadd.f32 %v1707_v40, %v1465_v19  ;;  %v1712_v23 = vmax.f32 %v1665_v47, 0.0  ;;  %v1714_v34 = vmax.f32 %v1706_v43, 0.0 }
 0x36c   :  { %v1668_v8 = vpop.f32.mrf.mxu0  ;;  %v1709_v44 = vpop.f32.mrf.mxu1 }
 0x36d   :  { %v1713_v62 = vmax.f32 %v1667_v22, 0.0  ;;  %v1715_v57 = vmax.f32 %v1708_v35, 0.0  ;;  %v1716_v58 = vpack.c.bf16 %v1712_v23, %v1712_v23  ;;  %v1718_v33 = vpack.c.bf16 %v1714_v34, %v1714_v34 }
 0x36e   :  { %v1669_v39 = vpop.f32.mrf.mxu0  ;;  %v1710_v48 = vpop.f32.mrf.mxu1 }
 0x36f   :  { %v1717_v52 = vpack.c.bf16 %v1713_v62, %v1713_v62  ;;  %v1719_v37 = vpack.c.bf16 %v1715_v57, %v1715_v57 }
 0x371   :  { %2012 = vmatprep.mubr.bf16.mxu0 %v1717_v52  ;;  %2052 = vmatprep.mubr.bf16.mxu1 %v1719_v37 }
 0x372   :  { %2013 = vmatmul.mubr.bf16.vlgmr.msra.gmra.mxu0 %v1716_v58  ;;  %2053 = vmatmul.mubr.bf16.vlgmr.msra.gmra.mxu1 %v1718_v33 }
 0x432   :  { %v2363_v4 = vpop.f32.mrf.mxu0  ;;  %v2385_v5 = vpop.f32.mrf.mxu1 }
 0x434   :  { %v2364_v10 = vpop.f32.mrf.mxu0  ;;  %v2386_v11 = vpop.f32.mrf.mxu1 }
 0x435   :  { %v2365_v12 = vadd.f32 %v2364_v10, %v2363_v4  ;;  %v2387_v18 = vadd.f32 %v2386_v11, %v2385_v5 }
 0x436   :  { %v2366_v15 = vpop.f32.mrf.mxu0  ;;  %v2388_v16 = vpop.f32.mrf.mxu1 }
 0x437   :  { %v2015_v17 = vadd.f32 %v2365_v12, %v1787_v6 }
 0x438   :  { %v2367_v20 = vpop.f32.mrf.mxu0  ;;  %v2389_v21 = vpop.f32.mrf.mxu1 }
 0x439   :  { %v2055_v61 = vadd.f32 %v2387_v18, %v2015_v17 }
 0x43b   :  { %2060 = vst [vmem:[#allocation13] sm:$0xf] %v2055_v61 }
 0x43c   :  { %3040 = shalt.err (!%p3037_p6)
}
 0x43d   :  { %2070 = dma.vmem_to_hbm [thread:$0]  %s2068_s5, 64, %s3792_s6, [#allocation4]  }
 0x43e   :  { %3057 = dma.done.wait [#allocation4], 64  }
 0x43f   :  { %3058 = vsyncadd [#allocation4], 4294967232 }
 0x440   :  { %2074 = vsyncpa [#allocation3], 1 }
 0x441   :  { %2075 = vsyncpa [#allocation6], 1 }
 0x442   :  { %2076 = vsyncpa [#allocation9], 1 }
 0x443   :  { %2077 = vsyncpa [#allocation12], 1 }
 0x444   :  { %2078 = vsyncpa [#allocation4], 1 }

</bundles_post_ra>
